<compile_context>
chip_gen: v7x
topology: tpu7x:2x2x1
jax: 0.10.0
libtpu: 0.0.40
codegen_flags: <defaults>
</compile_context>

<pallas_src>
import numpy as np
import jax
import jax.numpy as jnp
from jax import lax
from jax.experimental import pallas as pl
from jax.experimental.pallas import tpu as pltpu

EMB = 70          # real feature width
FP = 128          # lane-padded feature width
ATOM_DIMS = [119, 4, 12, 12, 10, 6, 6, 2, 2]   # OGB get_atom_feature_dims()
BOND_DIMS = [5, 6, 2]                           # OGB get_bond_feature_dims()


# ----------------------------------------------------------------------------
# Kernel 1: one PNAConvSimple layer (+ BatchNorm + ReLU + residual), node-tiled.
# ----------------------------------------------------------------------------
def pna_layer_kernel(x_ref, xj_ref, eg_ref, deg_ref, scal_ref,
                     w_ref, b_ref, bn_s_ref, bn_b_ref, out_ref):
    x = x_ref[...]                       # [TM, FP]  target-node features (lane-padded)
    deg = deg_ref[...]                   # [TM, 1]   in-degree (float)
    avg_log = scal_ref[0]                # scalar in SMEM: avg_deg['log']
    inv_avg = scal_ref[1]                # scalar in SMEM: 1 / avg_deg['log']

    tm, fp = x.shape
    dmax = xj_ref.shape[0]

    s1 = jnp.zeros((tm, fp), jnp.float32)
    s2 = jnp.zeros((tm, fp), jnp.float32)
    mmax = jnp.zeros((tm, fp), jnp.float32)          # messages are >= 0, so 0-init is exact
    mmin = jnp.full((tm, fp), 1e30, jnp.float32)

    # Unrolled over the (small) max in-degree.  message = relu(x_i + x_j + e_ij).
    # Padded slots are masked via the per-node degree (slots are filled densely from 0).
    for d in range(dmax):
        valid = (deg >= (d + 1.0)).astype(jnp.float32)            # [TM, 1]
        m = jnp.maximum(x + xj_ref[d] + eg_ref[d], 0.0) * valid   # [TM, FP]
        s1 = s1 + m
        s2 = s2 + m * m
        mmax = jnp.maximum(mmax, m)                               # pad slots contribute 0 (<= max)
        mmin = jnp.minimum(mmin, m + (1.0 - valid) * 1e30)

    has = (deg > 0.0).astype(jnp.float32)                         # [TM, 1]
    cnt = jnp.maximum(deg, 1.0)
    inv_cnt = pl.reciprocal(cnt, approx=True)                     # EUP slot
    mean = s1 * inv_cnt
    var = jnp.maximum(s2 * inv_cnt - mean * mean, 0.0) + 1e-5
    std = var * lax.rsqrt(var)                                    # sqrt via EUP rsqrt
    mmin = mmin * has                                             # deg==0 -> 0 fallback
    # mmax already 0 when deg==0

    # degree scalers: identity, amplification, attenuation
    logd = jnp.log(deg + 1.0)                                     # [TM, 1]
    amp = logd * inv_avg
    att = has * (avg_log * pl.reciprocal(jnp.maximum(logd, 1e-12), approx=True)) + (1.0 - has)

    # post_nn: Linear(12*FP -> FP) as ONE bf16 MXU dot with K = 12*FP.
    bf = jnp.bfloat16
    pieces = [mean, mmin, mmax, std,
              mean * amp, mmin * amp, mmax * amp, std * amp,
              mean * att, mmin * att, mmax * att, std * att]
    feat = jnp.concatenate([p.astype(bf) for p in pieces], axis=-1)   # [TM, 12*FP] bf16

    acc = jnp.dot(feat, w_ref[...], preferred_element_type=jnp.float32) + b_ref[...]

    # eval-mode BatchNorm (folded scale/shift), ReLU, residual
    h = jnp.maximum(acc * bn_s_ref[...] + bn_b_ref[...], 0.0)
    out_ref[...] = h + x


def pna_layer(x_pad, xj_slot, eg_slot, deg_col, scal, W, b, bn_scale, bn_shift, tm):
    npad, fp = x_pad.shape
    dmax = xj_slot.shape[0]
    grid = (npad // tm,)
    return pl.pallas_call(
        pna_layer_kernel,
        out_shape=jax.ShapeDtypeStruct((npad, fp), jnp.float32),
        grid_spec=pltpu.PrefetchScalarGridSpec(
            num_scalar_prefetch=0,
            grid=grid,
            in_specs=[
                pl.BlockSpec((tm, fp), lambda i: (i, 0)),            # x
                pl.BlockSpec((dmax, tm, fp), lambda i: (0, i, 0)),   # gathered neighbor feats
                pl.BlockSpec((dmax, tm, fp), lambda i: (0, i, 0)),   # gathered bond embeddings
                pl.BlockSpec((tm, 1), lambda i: (i, 0)),             # in-degree column
                pl.BlockSpec(memory_space=pltpu.MemorySpace.SMEM),   # [avg_log, 1/avg_log]
                pl.BlockSpec((12 * fp, fp), lambda i: (0, 0)),       # fused post_nn weight (bf16)
                pl.BlockSpec((1, fp), lambda i: (0, 0)),             # post_nn bias
                pl.BlockSpec((1, fp), lambda i: (0, 0)),             # bn scale
                pl.BlockSpec((1, fp), lambda i: (0, 0)),             # bn shift
            ],
            out_specs=pl.BlockSpec((tm, fp), lambda i: (i, 0)),
        ),
        compiler_params=pltpu.CompilerParams(dimension_semantics=("parallel",)),
    )(x_pad, xj_slot, eg_slot, deg_col, scal, W, b, bn_scale, bn_shift)


# ----------------------------------------------------------------------------
# Kernel 2: global_mean_pool (normalized one-hot matmul) + 3-layer MLP head.
# All weights are lane-padded to 128; real output is column 0.
# ----------------------------------------------------------------------------
def pool_mlp_kernel(x_ref, p_ref, w1_ref, b1_ref, w2_ref, b2_ref, w3_ref, b3_ref, o_ref):
    g = jnp.dot(p_ref[...], x_ref[...], preferred_element_type=jnp.float32)   # [G, FP]
    h = jnp.maximum(jnp.dot(g, w1_ref[...], preferred_element_type=jnp.float32)
                    + b1_ref[...], 0.0)
    h = jnp.maximum(jnp.dot(h, w2_ref[...], preferred_element_type=jnp.float32)
                    + b2_ref[...], 0.0)
    o_ref[...] = jnp.dot(h, w3_ref[...], preferred_element_type=jnp.float32) + b3_ref[...]


def pool_mlp(x, pool, mlp):
    G = pool.shape[0]
    vmem = pl.BlockSpec(memory_space=pltpu.MemorySpace.VMEM)
    out = pl.pallas_call(
        pool_mlp_kernel,
        out_shape=jax.ShapeDtypeStruct((G, 128), jnp.float32),
        in_specs=[vmem] * 8,
        out_specs=vmem,
    )(x, pool, mlp["w1"], mlp["b1"], mlp["w2"], mlp["b2"], mlp["w3"], mlp["b3"])
    return out[:, :1]


# ----------------------------------------------------------------------------
# Parameters (deterministic, synthetic), stored pre-padded to FP=128 lanes.
# ----------------------------------------------------------------------------
def init_params(key):
    keys = iter(jax.random.split(key, 256))

    def nrm(shape, scale):
        return (scale * jax.random.normal(next(keys), shape)).astype(jnp.float32)

    def pad_to(a, shape):
        out = jnp.zeros(shape, a.dtype)
        return out.at[tuple(slice(0, s) for s in a.shape)].set(a)

    params = {"atom_emb": [pad_to(nrm((d, EMB), 0.1), (d, FP)) for d in ATOM_DIMS]}

    convs = []
    for _ in range(4):
        gamma = 1.0 + nrm((1, EMB), 0.05)
        beta = nrm((1, EMB), 0.05)
        rmean = nrm((1, EMB), 0.05)
        rvar = 1.0 + 0.1 * jax.random.uniform(next(keys), (1, EMB))
        bn_scale = (gamma / jnp.sqrt(rvar + 1e-5)).astype(jnp.float32)
        bn_shift = (beta - rmean * bn_scale).astype(jnp.float32)
        # Linear(12*70 -> 70) stored fused + padded as [12*FP, FP] bf16
        # chunk k = scaler-major, aggregator-minor (mean,min,max,std) x (id, amp, att)
        w = nrm((12, EMB, EMB), 1.0 / np.sqrt(12 * EMB))
        w_pad = jnp.zeros((12, FP, FP), jnp.float32).at[:, :EMB, :EMB].set(w)
        convs.append({
            "bond_emb": [pad_to(nrm((d, EMB), 0.1), (d, FP)) for d in BOND_DIMS],
            "W": w_pad.reshape(12 * FP, FP).astype(jnp.bfloat16),
            "b": pad_to(nrm((1, EMB), 0.01), (1, FP)),
            "bn_scale": pad_to(bn_scale, (1, FP)),
            "bn_shift": pad_to(bn_shift, (1, FP)),
        })
    params["convs"] = convs
    params["mlp"] = {
        "w1": pad_to(nrm((EMB, 35), 1.0 / np.sqrt(EMB)), (FP, 128)),
        "b1": pad_to(nrm((1, 35), 0.01), (1, 128)),
        "w2": pad_to(nrm((35, 17), 1.0 / np.sqrt(35)), (128, 128)),
        "b2": pad_to(nrm((1, 17), 0.01), (1, 128)),
        "w3": pad_to(nrm((17, 1), 1.0 / np.sqrt(17)), (128, 128)),
        "b3": pad_to(nrm((1, 1), 0.01), (1, 128)),
    }
    return params


# ----------------------------------------------------------------------------
# Full forward pass (glue in JAX/numpy, hot paths in the two Pallas kernels)
# ----------------------------------------------------------------------------
def net_forward(params, x_atoms, edge_index, edge_attr, batch, num_graphs, dmax=8):
    N = x_atoms.shape[0]
    src, dst = edge_index[0], edge_index[1]          # numpy int arrays
    E = src.shape[0]

    # node-tile size: 128 for real workloads (use 256 on v6e/v7x if desired),
    # shrink to a multiple of 8 for tiny demo graphs.
    TM = 128 if N >= 128 else ((max(N, 8) + 7) // 8) * 8
    Npad = ((N + TM - 1) // TM) * TM

    # AtomEncoder: sum of per-feature embeddings, scattered into padded [Npad, FP]
    xa = jnp.zeros((N, FP), jnp.float32)
    for f in range(len(ATOM_DIMS)):
        xa = xa + params["atom_emb"][f][x_atoms[:, f]]
    x = jnp.zeros((Npad, FP), jnp.float32).at[:N].set(xa)

    # Padded incoming-edge structure per target node, slot-major (host-side glue).
    nbr_src = np.zeros((dmax, Npad), np.int32)       # source node index per (slot, node)
    eslot = np.zeros((dmax, Npad), np.int32)         # edge id per (slot, node)
    counts = np.zeros((N,), np.int32)
    for e in range(E):
        i = int(dst[e])
        s = counts[i]
        nbr_src[s, i] = int(src[e])
        eslot[s, i] = e
        counts[i] += 1
    assert counts.max() <= dmax
    deg_col = np.zeros((Npad, 1), np.float32)
    deg_col[:N, 0] = counts
    avg_log = float(np.mean(np.log(counts.astype(np.float64) + 1.0)))

    nbr_src_j = jnp.asarray(nbr_src)
    eslot_j = jnp.asarray(eslot)
    deg_j = jnp.asarray(deg_col)
    scal = jnp.asarray([avg_log, 1.0 / max(avg_log, 1e-12)], jnp.float32)
    edge_attr_j = jnp.asarray(edge_attr)

    for l in range(4):
        lp = params["convs"][l]
        # BondEncoder: sum of per-feature bond embeddings (lane-padded)
        e_emb = jnp.zeros((E, FP), jnp.float32)
        for f in range(len(BOND_DIMS)):
            e_emb = e_emb + lp["bond_emb"][f][edge_attr_j[:, f]]
        xj_slot = x[nbr_src_j]           # [Dmax, Npad, FP]  source-node feats per slot
        eg_slot = e_emb[eslot_j]         # [Dmax, Npad, FP]  bond embeddings per slot
        x = pna_layer(x, xj_slot, eg_slot, deg_j, scal,
                      lp["W"], lp["b"], lp["bn_scale"], lp["bn_shift"], TM)
        # F.dropout(x, 0.3, training=False) -> identity

    # global_mean_pool as a row-normalized one-hot matrix (reduction done in-kernel)
    onehot = (np.arange(num_graphs)[:, None] == batch[None, :]).astype(np.float32)
    pool = onehot / np.maximum(onehot.sum(axis=1, keepdims=True), 1.0)
    return pool_mlp(x[:N], jnp.asarray(pool), params["mlp"])


# ----------------------------------------------------------------------------
if __name__ == "__main__":
    key = jax.random.PRNGKey(0)
    pkey, dkey = jax.random.split(key)
    params = init_params(pkey)

    # Synthetic batched molecular graph: 3 graphs x 8 nodes, ring topology (both directions)
    G, NODES_PER_G = 3, 8
    N = G * NODES_PER_G
    edges = []
    for g in range(G):
        base = g * NODES_PER_G
        for k in range(NODES_PER_G):
            a, b = base + k, base + (k + 1) % NODES_PER_G
            edges.append((a, b))
            edges.append((b, a))
    edge_index = np.asarray(edges, dtype=np.int32).T          # [2, E], row0=src, row1=dst
    E = edge_index.shape[1]

    fkeys = jax.random.split(dkey, len(ATOM_DIMS) + len(BOND_DIMS))
    x_atoms = jnp.stack(
        [jax.random.randint(fkeys[f], (N,), 0, ATOM_DIMS[f]) for f in range(len(ATOM_DIMS))],
        axis=1).astype(jnp.int32)                              # [N, 9]
    edge_attr = jnp.stack(
        [jax.random.randint(fkeys[len(ATOM_DIMS) + f], (E,), 0, BOND_DIMS[f])
         for f in range(len(BOND_DIMS))],
        axis=1).astype(jnp.int32)                              # [E, 3]
    batch = np.repeat(np.arange(G), NODES_PER_G).astype(np.int32)   # [N]

    out = net_forward(params, np.asarray(x_atoms), edge_index, np.asarray(edge_attr), batch, G)
    out = jax.block_until_ready(out)
    assert out.shape == (G, 1) and bool(jnp.all(jnp.isfinite(out)))
    print("KERNEL_OK")
</pallas_src>

<mosaic_0001>
module attributes {stable_mosaic.version = 11 : i64} {
  func.func @pna_layer_kernel(%arg0: i32, %arg1: memref<24x128xf32, #tpu.memory_space<vmem>>, %arg2: memref<8x24x128xf32, #tpu.memory_space<vmem>>, %arg3: memref<8x24x128xf32, #tpu.memory_space<vmem>>, %arg4: memref<24x1xf32, #tpu.memory_space<vmem>>, %arg5: memref<2xf32, #tpu.memory_space<smem>>, %arg6: memref<1536x128xbf16, #tpu.memory_space<vmem>>, %arg7: memref<1x128xf32, #tpu.memory_space<vmem>>, %arg8: memref<1x128xf32, #tpu.memory_space<vmem>>, %arg9: memref<1x128xf32, #tpu.memory_space<vmem>>, %arg10: memref<24x128xf32, #tpu.memory_space<vmem>>) attributes {dimension_semantics = [#tpu.dimension_semantics<parallel>], iteration_bounds = array<i64: 1>, scalar_prefetch = 0 : i64, scratch_operands = 0 : i64, tpu.core_type = #tpu.core_type<tc>, window_params = [{transform_indices = @transform_0, window_bounds = array<i64: 24, 128>}, {transform_indices = @transform_1, window_bounds = array<i64: 8, 24, 128>}, {transform_indices = @transform_2, window_bounds = array<i64: 8, 24, 128>}, {transform_indices = @transform_3, window_bounds = array<i64: 24, 1>}, {transform_indices = @transform_4, window_bounds = array<i64: 2>}, {pipeline_mode = #tpu.pipeline_mode<synchronous>, transform_indices = @transform_5, window_bounds = array<i64: 1536, 128>}, {pipeline_mode = #tpu.pipeline_mode<synchronous>, transform_indices = @transform_6, window_bounds = array<i64: 1, 128>}, {pipeline_mode = #tpu.pipeline_mode<synchronous>, transform_indices = @transform_7, window_bounds = array<i64: 1, 128>}, {pipeline_mode = #tpu.pipeline_mode<synchronous>, transform_indices = @transform_8, window_bounds = array<i64: 1, 128>}, {transform_indices = @transform_9, window_bounds = array<i64: 24, 128>}]} {
    %c0 = arith.constant 0 : index
    %c0_0 = arith.constant 0 : index
    %0 = vector.load %arg1[%c0, %c0_0] : memref<24x128xf32, #tpu.memory_space<vmem>>, vector<24x128xf32>
    %c0_1 = arith.constant 0 : index
    %c0_2 = arith.constant 0 : index
    %1 = vector.load %arg4[%c0_1, %c0_2] : memref<24x1xf32, #tpu.memory_space<vmem>>, vector<24x1xf32>
    %c0_3 = arith.constant 0 : index
    %2 = memref.load %arg5[%c0_3] : memref<2xf32, #tpu.memory_space<smem>>
    %c1 = arith.constant 1 : index
    %3 = memref.load %arg5[%c1] : memref<2xf32, #tpu.memory_space<smem>>
    %cst = arith.constant 0.000000e+00 : f32
    %4 = vector.broadcast %cst : f32 to vector<24x128xf32>
    %cst_4 = arith.constant 0.000000e+00 : f32
    %5 = vector.broadcast %cst_4 : f32 to vector<24x128xf32>
    %cst_5 = arith.constant 0.000000e+00 : f32
    %6 = vector.broadcast %cst_5 : f32 to vector<24x128xf32>
    %cst_6 = arith.constant 1.000000e+30 : f32
    %7 = vector.broadcast %cst_6 : f32 to vector<24x128xf32>
    %cst_7 = arith.constant 1.000000e+00 : f32
    %8 = vector.broadcast %cst_7 : f32 to vector<24x1xf32>
    %9 = arith.cmpf oge, %1, %8 : vector<24x1xf32>
    %10 = arith.extui %9 : vector<24x1xi1> to vector<24x1xi32>
    %11 = arith.sitofp %10 : vector<24x1xi32> to vector<24x1xf32>
    %c0_8 = arith.constant 0 : index
    %c0_9 = arith.constant 0 : index
    %c0_10 = arith.constant 0 : index
    %12 = vector.load %arg2[%c0_8, %c0_9, %c0_10] : memref<8x24x128xf32, #tpu.memory_space<vmem>>, vector<1x24x128xf32>
    %13 = vector.shape_cast %12 : vector<1x24x128xf32> to vector<24x128xf32>
    %14 = arith.addf %0, %13 : vector<24x128xf32>
    %c0_11 = arith.constant 0 : index
    %c0_12 = arith.constant 0 : index
    %c0_13 = arith.constant 0 : index
    %15 = vector.load %arg3[%c0_11, %c0_12, %c0_13] : memref<8x24x128xf32, #tpu.memory_space<vmem>>, vector<1x24x128xf32>
    %16 = vector.shape_cast %15 : vector<1x24x128xf32> to vector<24x128xf32>
    %17 = arith.addf %14, %16 : vector<24x128xf32>
    %cst_14 = arith.constant 0.000000e+00 : f32
    %18 = vector.broadcast %cst_14 : f32 to vector<24x128xf32>
    %19 = arith.maximumf %17, %18 : vector<24x128xf32>
    %20 = vector.broadcast %11 : vector<24x1xf32> to vector<24x128xf32>
    %21 = arith.mulf %19, %20 : vector<24x128xf32>
    %22 = arith.addf %4, %21 : vector<24x128xf32>
    %23 = arith.mulf %21, %21 : vector<24x128xf32>
    %24 = arith.addf %5, %23 : vector<24x128xf32>
    %25 = arith.maximumf %6, %21 : vector<24x128xf32>
    %cst_15 = arith.constant 1.000000e+00 : f32
    %26 = vector.broadcast %cst_15 : f32 to vector<24x1xf32>
    %27 = arith.subf %26, %11 : vector<24x1xf32>
    %cst_16 = arith.constant 1.000000e+30 : f32
    %28 = vector.broadcast %cst_16 : f32 to vector<24x1xf32>
    %29 = arith.mulf %27, %28 : vector<24x1xf32>
    %30 = vector.broadcast %29 : vector<24x1xf32> to vector<24x128xf32>
    %31 = arith.addf %21, %30 : vector<24x128xf32>
    %32 = arith.minimumf %7, %31 : vector<24x128xf32>
    %cst_17 = arith.constant 2.000000e+00 : f32
    %33 = vector.broadcast %cst_17 : f32 to vector<24x1xf32>
    %34 = arith.cmpf oge, %1, %33 : vector<24x1xf32>
    %35 = arith.extui %34 : vector<24x1xi1> to vector<24x1xi32>
    %36 = arith.sitofp %35 : vector<24x1xi32> to vector<24x1xf32>
    %c1_18 = arith.constant 1 : index
    %c0_19 = arith.constant 0 : index
    %c0_20 = arith.constant 0 : index
    %37 = vector.load %arg2[%c1_18, %c0_19, %c0_20] : memref<8x24x128xf32, #tpu.memory_space<vmem>>, vector<1x24x128xf32>
    %38 = vector.shape_cast %37 : vector<1x24x128xf32> to vector<24x128xf32>
    %39 = arith.addf %0, %38 : vector<24x128xf32>
    %c1_21 = arith.constant 1 : index
    %c0_22 = arith.constant 0 : index
    %c0_23 = arith.constant 0 : index
    %40 = vector.load %arg3[%c1_21, %c0_22, %c0_23] : memref<8x24x128xf32, #tpu.memory_space<vmem>>, vector<1x24x128xf32>
    %41 = vector.shape_cast %40 : vector<1x24x128xf32> to vector<24x128xf32>
    %42 = arith.addf %39, %41 : vector<24x128xf32>
    %cst_24 = arith.constant 0.000000e+00 : f32
    %43 = vector.broadcast %cst_24 : f32 to vector<24x128xf32>
    %44 = arith.maximumf %42, %43 : vector<24x128xf32>
    %45 = vector.broadcast %36 : vector<24x1xf32> to vector<24x128xf32>
    %46 = arith.mulf %44, %45 : vector<24x128xf32>
    %47 = arith.addf %22, %46 : vector<24x128xf32>
    %48 = arith.mulf %46, %46 : vector<24x128xf32>
    %49 = arith.addf %24, %48 : vector<24x128xf32>
    %50 = arith.maximumf %25, %46 : vector<24x128xf32>
    %cst_25 = arith.constant 1.000000e+00 : f32
    %51 = vector.broadcast %cst_25 : f32 to vector<24x1xf32>
    %52 = arith.subf %51, %36 : vector<24x1xf32>
    %cst_26 = arith.constant 1.000000e+30 : f32
    %53 = vector.broadcast %cst_26 : f32 to vector<24x1xf32>
    %54 = arith.mulf %52, %53 : vector<24x1xf32>
    %55 = vector.broadcast %54 : vector<24x1xf32> to vector<24x128xf32>
    %56 = arith.addf %46, %55 : vector<24x128xf32>
    %57 = arith.minimumf %32, %56 : vector<24x128xf32>
    %cst_27 = arith.constant 3.000000e+00 : f32
    %58 = vector.broadcast %cst_27 : f32 to vector<24x1xf32>
    %59 = arith.cmpf oge, %1, %58 : vector<24x1xf32>
    %60 = arith.extui %59 : vector<24x1xi1> to vector<24x1xi32>
    %61 = arith.sitofp %60 : vector<24x1xi32> to vector<24x1xf32>
    %c2 = arith.constant 2 : index
    %c0_28 = arith.constant 0 : index
    %c0_29 = arith.constant 0 : index
    %62 = vector.load %arg2[%c2, %c0_28, %c0_29] : memref<8x24x128xf32, #tpu.memory_space<vmem>>, vector<1x24x128xf32>
    %63 = vector.shape_cast %62 : vector<1x24x128xf32> to vector<24x128xf32>
    %64 = arith.addf %0, %63 : vector<24x128xf32>
    %c2_30 = arith.constant 2 : index
    %c0_31 = arith.constant 0 : index
    %c0_32 = arith.constant 0 : index
    %65 = vector.load %arg3[%c2_30, %c0_31, %c0_32] : memref<8x24x128xf32, #tpu.memory_space<vmem>>, vector<1x24x128xf32>
    %66 = vector.shape_cast %65 : vector<1x24x128xf32> to vector<24x128xf32>
    %67 = arith.addf %64, %66 : vector<24x128xf32>
    %cst_33 = arith.constant 0.000000e+00 : f32
    %68 = vector.broadcast %cst_33 : f32 to vector<24x128xf32>
    %69 = arith.maximumf %67, %68 : vector<24x128xf32>
    %70 = vector.broadcast %61 : vector<24x1xf32> to vector<24x128xf32>
    %71 = arith.mulf %69, %70 : vector<24x128xf32>
    %72 = arith.addf %47, %71 : vector<24x128xf32>
    %73 = arith.mulf %71, %71 : vector<24x128xf32>
    %74 = arith.addf %49, %73 : vector<24x128xf32>
    %75 = arith.maximumf %50, %71 : vector<24x128xf32>
    %cst_34 = arith.constant 1.000000e+00 : f32
    %76 = vector.broadcast %cst_34 : f32 to vector<24x1xf32>
    %77 = arith.subf %76, %61 : vector<24x1xf32>
    %cst_35 = arith.constant 1.000000e+30 : f32
    %78 = vector.broadcast %cst_35 : f32 to vector<24x1xf32>
    %79 = arith.mulf %77, %78 : vector<24x1xf32>
    %80 = vector.broadcast %79 : vector<24x1xf32> to vector<24x128xf32>
    %81 = arith.addf %71, %80 : vector<24x128xf32>
    %82 = arith.minimumf %57, %81 : vector<24x128xf32>
    %cst_36 = arith.constant 4.000000e+00 : f32
    %83 = vector.broadcast %cst_36 : f32 to vector<24x1xf32>
    %84 = arith.cmpf oge, %1, %83 : vector<24x1xf32>
    %85 = arith.extui %84 : vector<24x1xi1> to vector<24x1xi32>
    %86 = arith.sitofp %85 : vector<24x1xi32> to vector<24x1xf32>
    %c3 = arith.constant 3 : index
    %c0_37 = arith.constant 0 : index
    %c0_38 = arith.constant 0 : index
    %87 = vector.load %arg2[%c3, %c0_37, %c0_38] : memref<8x24x128xf32, #tpu.memory_space<vmem>>, vector<1x24x128xf32>
    %88 = vector.shape_cast %87 : vector<1x24x128xf32> to vector<24x128xf32>
    %89 = arith.addf %0, %88 : vector<24x128xf32>
    %c3_39 = arith.constant 3 : index
    %c0_40 = arith.constant 0 : index
    %c0_41 = arith.constant 0 : index
    %90 = vector.load %arg3[%c3_39, %c0_40, %c0_41] : memref<8x24x128xf32, #tpu.memory_space<vmem>>, vector<1x24x128xf32>
    %91 = vector.shape_cast %90 : vector<1x24x128xf32> to vector<24x128xf32>
    %92 = arith.addf %89, %91 : vector<24x128xf32>
    %cst_42 = arith.constant 0.000000e+00 : f32
    %93 = vector.broadcast %cst_42 : f32 to vector<24x128xf32>
    %94 = arith.maximumf %92, %93 : vector<24x128xf32>
    %95 = vector.broadcast %86 : vector<24x1xf32> to vector<24x128xf32>
    %96 = arith.mulf %94, %95 : vector<24x128xf32>
    %97 = arith.addf %72, %96 : vector<24x128xf32>
    %98 = arith.mulf %96, %96 : vector<24x128xf32>
    %99 = arith.addf %74, %98 : vector<24x128xf32>
    %100 = arith.maximumf %75, %96 : vector<24x128xf32>
    %cst_43 = arith.constant 1.000000e+00 : f32
    %101 = vector.broadcast %cst_43 : f32 to vector<24x1xf32>
    %102 = arith.subf %101, %86 : vector<24x1xf32>
    %cst_44 = arith.constant 1.000000e+30 : f32
    %103 = vector.broadcast %cst_44 : f32 to vector<24x1xf32>
    %104 = arith.mulf %102, %103 : vector<24x1xf32>
    %105 = vector.broadcast %104 : vector<24x1xf32> to vector<24x128xf32>
    %106 = arith.addf %96, %105 : vector<24x128xf32>
    %107 = arith.minimumf %82, %106 : vector<24x128xf32>
    %cst_45 = arith.constant 5.000000e+00 : f32
    %108 = vector.broadcast %cst_45 : f32 to vector<24x1xf32>
    %109 = arith.cmpf oge, %1, %108 : vector<24x1xf32>
    %110 = arith.extui %109 : vector<24x1xi1> to vector<24x1xi32>
    %111 = arith.sitofp %110 : vector<24x1xi32> to vector<24x1xf32>
    %c4 = arith.constant 4 : index
    %c0_46 = arith.constant 0 : index
    %c0_47 = arith.constant 0 : index
    %112 = vector.load %arg2[%c4, %c0_46, %c0_47] : memref<8x24x128xf32, #tpu.memory_space<vmem>>, vector<1x24x128xf32>
    %113 = vector.shape_cast %112 : vector<1x24x128xf32> to vector<24x128xf32>
    %114 = arith.addf %0, %113 : vector<24x128xf32>
    %c4_48 = arith.constant 4 : index
    %c0_49 = arith.constant 0 : index
    %c0_50 = arith.constant 0 : index
    %115 = vector.load %arg3[%c4_48, %c0_49, %c0_50] : memref<8x24x128xf32, #tpu.memory_space<vmem>>, vector<1x24x128xf32>
    %116 = vector.shape_cast %115 : vector<1x24x128xf32> to vector<24x128xf32>
    %117 = arith.addf %114, %116 : vector<24x128xf32>
    %cst_51 = arith.constant 0.000000e+00 : f32
    %118 = vector.broadcast %cst_51 : f32 to vector<24x128xf32>
    %119 = arith.maximumf %117, %118 : vector<24x128xf32>
    %120 = vector.broadcast %111 : vector<24x1xf32> to vector<24x128xf32>
    %121 = arith.mulf %119, %120 : vector<24x128xf32>
    %122 = arith.addf %97, %121 : vector<24x128xf32>
    %123 = arith.mulf %121, %121 : vector<24x128xf32>
    %124 = arith.addf %99, %123 : vector<24x128xf32>
    %125 = arith.maximumf %100, %121 : vector<24x128xf32>
    %cst_52 = arith.constant 1.000000e+00 : f32
    %126 = vector.broadcast %cst_52 : f32 to vector<24x1xf32>
    %127 = arith.subf %126, %111 : vector<24x1xf32>
    %cst_53 = arith.constant 1.000000e+30 : f32
    %128 = vector.broadcast %cst_53 : f32 to vector<24x1xf32>
    %129 = arith.mulf %127, %128 : vector<24x1xf32>
    %130 = vector.broadcast %129 : vector<24x1xf32> to vector<24x128xf32>
    %131 = arith.addf %121, %130 : vector<24x128xf32>
    %132 = arith.minimumf %107, %131 : vector<24x128xf32>
    %cst_54 = arith.constant 6.000000e+00 : f32
    %133 = vector.broadcast %cst_54 : f32 to vector<24x1xf32>
    %134 = arith.cmpf oge, %1, %133 : vector<24x1xf32>
    %135 = arith.extui %134 : vector<24x1xi1> to vector<24x1xi32>
    %136 = arith.sitofp %135 : vector<24x1xi32> to vector<24x1xf32>
    %c5 = arith.constant 5 : index
    %c0_55 = arith.constant 0 : index
    %c0_56 = arith.constant 0 : index
    %137 = vector.load %arg2[%c5, %c0_55, %c0_56] : memref<8x24x128xf32, #tpu.memory_space<vmem>>, vector<1x24x128xf32>
    %138 = vector.shape_cast %137 : vector<1x24x128xf32> to vector<24x128xf32>
    %139 = arith.addf %0, %138 : vector<24x128xf32>
    %c5_57 = arith.constant 5 : index
    %c0_58 = arith.constant 0 : index
    %c0_59 = arith.constant 0 : index
    %140 = vector.load %arg3[%c5_57, %c0_58, %c0_59] : memref<8x24x128xf32, #tpu.memory_space<vmem>>, vector<1x24x128xf32>
    %141 = vector.shape_cast %140 : vector<1x24x128xf32> to vector<24x128xf32>
    %142 = arith.addf %139, %141 : vector<24x128xf32>
    %cst_60 = arith.constant 0.000000e+00 : f32
    %143 = vector.broadcast %cst_60 : f32 to vector<24x128xf32>
    %144 = arith.maximumf %142, %143 : vector<24x128xf32>
    %145 = vector.broadcast %136 : vector<24x1xf32> to vector<24x128xf32>
    %146 = arith.mulf %144, %145 : vector<24x128xf32>
    %147 = arith.addf %122, %146 : vector<24x128xf32>
    %148 = arith.mulf %146, %146 : vector<24x128xf32>
    %149 = arith.addf %124, %148 : vector<24x128xf32>
    %150 = arith.maximumf %125, %146 : vector<24x128xf32>
    %cst_61 = arith.constant 1.000000e+00 : f32
    %151 = vector.broadcast %cst_61 : f32 to vector<24x1xf32>
    %152 = arith.subf %151, %136 : vector<24x1xf32>
    %cst_62 = arith.constant 1.000000e+30 : f32
    %153 = vector.broadcast %cst_62 : f32 to vector<24x1xf32>
    %154 = arith.mulf %152, %153 : vector<24x1xf32>
    %155 = vector.broadcast %154 : vector<24x1xf32> to vector<24x128xf32>
    %156 = arith.addf %146, %155 : vector<24x128xf32>
    %157 = arith.minimumf %132, %156 : vector<24x128xf32>
    %cst_63 = arith.constant 7.000000e+00 : f32
    %158 = vector.broadcast %cst_63 : f32 to vector<24x1xf32>
    %159 = arith.cmpf oge, %1, %158 : vector<24x1xf32>
    %160 = arith.extui %159 : vector<24x1xi1> to vector<24x1xi32>
    %161 = arith.sitofp %160 : vector<24x1xi32> to vector<24x1xf32>
    %c6 = arith.constant 6 : index
    %c0_64 = arith.constant 0 : index
    %c0_65 = arith.constant 0 : index
    %162 = vector.load %arg2[%c6, %c0_64, %c0_65] : memref<8x24x128xf32, #tpu.memory_space<vmem>>, vector<1x24x128xf32>
    %163 = vector.shape_cast %162 : vector<1x24x128xf32> to vector<24x128xf32>
    %164 = arith.addf %0, %163 : vector<24x128xf32>
    %c6_66 = arith.constant 6 : index
    %c0_67 = arith.constant 0 : index
    %c0_68 = arith.constant 0 : index
    %165 = vector.load %arg3[%c6_66, %c0_67, %c0_68] : memref<8x24x128xf32, #tpu.memory_space<vmem>>, vector<1x24x128xf32>
    %166 = vector.shape_cast %165 : vector<1x24x128xf32> to vector<24x128xf32>
    %167 = arith.addf %164, %166 : vector<24x128xf32>
    %cst_69 = arith.constant 0.000000e+00 : f32
    %168 = vector.broadcast %cst_69 : f32 to vector<24x128xf32>
    %169 = arith.maximumf %167, %168 : vector<24x128xf32>
    %170 = vector.broadcast %161 : vector<24x1xf32> to vector<24x128xf32>
    %171 = arith.mulf %169, %170 : vector<24x128xf32>
    %172 = arith.addf %147, %171 : vector<24x128xf32>
    %173 = arith.mulf %171, %171 : vector<24x128xf32>
    %174 = arith.addf %149, %173 : vector<24x128xf32>
    %175 = arith.maximumf %150, %171 : vector<24x128xf32>
    %cst_70 = arith.constant 1.000000e+00 : f32
    %176 = vector.broadcast %cst_70 : f32 to vector<24x1xf32>
    %177 = arith.subf %176, %161 : vector<24x1xf32>
    %cst_71 = arith.constant 1.000000e+30 : f32
    %178 = vector.broadcast %cst_71 : f32 to vector<24x1xf32>
    %179 = arith.mulf %177, %178 : vector<24x1xf32>
    %180 = vector.broadcast %179 : vector<24x1xf32> to vector<24x128xf32>
    %181 = arith.addf %171, %180 : vector<24x128xf32>
    %182 = arith.minimumf %157, %181 : vector<24x128xf32>
    %cst_72 = arith.constant 8.000000e+00 : f32
    %183 = vector.broadcast %cst_72 : f32 to vector<24x1xf32>
    %184 = arith.cmpf oge, %1, %183 : vector<24x1xf32>
    %185 = arith.extui %184 : vector<24x1xi1> to vector<24x1xi32>
    %186 = arith.sitofp %185 : vector<24x1xi32> to vector<24x1xf32>
    %c7 = arith.constant 7 : index
    %c0_73 = arith.constant 0 : index
    %c0_74 = arith.constant 0 : index
    %187 = vector.load %arg2[%c7, %c0_73, %c0_74] : memref<8x24x128xf32, #tpu.memory_space<vmem>>, vector<1x24x128xf32>
    %188 = vector.shape_cast %187 : vector<1x24x128xf32> to vector<24x128xf32>
    %189 = arith.addf %0, %188 : vector<24x128xf32>
    %c7_75 = arith.constant 7 : index
    %c0_76 = arith.constant 0 : index
    %c0_77 = arith.constant 0 : index
    %190 = vector.load %arg3[%c7_75, %c0_76, %c0_77] : memref<8x24x128xf32, #tpu.memory_space<vmem>>, vector<1x24x128xf32>
    %191 = vector.shape_cast %190 : vector<1x24x128xf32> to vector<24x128xf32>
    %192 = arith.addf %189, %191 : vector<24x128xf32>
    %cst_78 = arith.constant 0.000000e+00 : f32
    %193 = vector.broadcast %cst_78 : f32 to vector<24x128xf32>
    %194 = arith.maximumf %192, %193 : vector<24x128xf32>
    %195 = vector.broadcast %186 : vector<24x1xf32> to vector<24x128xf32>
    %196 = arith.mulf %194, %195 : vector<24x128xf32>
    %197 = arith.addf %172, %196 : vector<24x128xf32>
    %198 = arith.mulf %196, %196 : vector<24x128xf32>
    %199 = arith.addf %174, %198 : vector<24x128xf32>
    %200 = arith.maximumf %175, %196 : vector<24x128xf32>
    %cst_79 = arith.constant 1.000000e+00 : f32
    %201 = vector.broadcast %cst_79 : f32 to vector<24x1xf32>
    %202 = arith.subf %201, %186 : vector<24x1xf32>
    %cst_80 = arith.constant 1.000000e+30 : f32
    %203 = vector.broadcast %cst_80 : f32 to vector<24x1xf32>
    %204 = arith.mulf %202, %203 : vector<24x1xf32>
    %205 = vector.broadcast %204 : vector<24x1xf32> to vector<24x128xf32>
    %206 = arith.addf %196, %205 : vector<24x128xf32>
    %207 = arith.minimumf %182, %206 : vector<24x128xf32>
    %cst_81 = arith.constant 0.000000e+00 : f32
    %208 = vector.broadcast %cst_81 : f32 to vector<24x1xf32>
    %209 = arith.cmpf ogt, %1, %208 : vector<24x1xf32>
    %210 = arith.extui %209 : vector<24x1xi1> to vector<24x1xi32>
    %211 = arith.sitofp %210 : vector<24x1xi32> to vector<24x1xf32>
    %cst_82 = arith.constant 1.000000e+00 : f32
    %212 = vector.broadcast %cst_82 : f32 to vector<24x1xf32>
    %213 = arith.maximumf %1, %212 : vector<24x1xf32>
    %214 = tpu.reciprocal %213 {approx = true} : vector<24x1xf32> -> vector<24x1xf32>
    %215 = vector.broadcast %214 : vector<24x1xf32> to vector<24x128xf32>
    %216 = arith.mulf %197, %215 : vector<24x128xf32>
    %217 = vector.broadcast %214 : vector<24x1xf32> to vector<24x128xf32>
    %218 = arith.mulf %199, %217 : vector<24x128xf32>
    %219 = arith.mulf %216, %216 : vector<24x128xf32>
    %220 = arith.subf %218, %219 : vector<24x128xf32>
    %cst_83 = arith.constant 0.000000e+00 : f32
    %221 = vector.broadcast %cst_83 : f32 to vector<24x128xf32>
    %222 = arith.maximumf %220, %221 : vector<24x128xf32>
    %cst_84 = arith.constant 9.99999974E-6 : f32
    %223 = vector.broadcast %cst_84 : f32 to vector<24x128xf32>
    %224 = arith.addf %222, %223 : vector<24x128xf32>
    %225 = math.rsqrt %224 : vector<24x128xf32>
    %226 = arith.mulf %224, %225 : vector<24x128xf32>
    %227 = vector.broadcast %211 : vector<24x1xf32> to vector<24x128xf32>
    %228 = arith.mulf %207, %227 : vector<24x128xf32>
    %cst_85 = arith.constant 1.000000e+00 : f32
    %229 = vector.broadcast %cst_85 : f32 to vector<24x1xf32>
    %230 = arith.addf %1, %229 : vector<24x1xf32>
    %231 = math.log %230 : vector<24x1xf32>
    %232 = vector.broadcast %3 : f32 to vector<24x1xf32>
    %233 = arith.mulf %231, %232 : vector<24x1xf32>
    %cst_86 = arith.constant 9.99999996E-13 : f32
    %234 = vector.broadcast %cst_86 : f32 to vector<24x1xf32>
    %235 = arith.maximumf %231, %234 : vector<24x1xf32>
    %236 = tpu.reciprocal %235 {approx = true} : vector<24x1xf32> -> vector<24x1xf32>
    %237 = vector.broadcast %2 : f32 to vector<24x1xf32>
    %238 = arith.mulf %237, %236 : vector<24x1xf32>
    %239 = arith.mulf %211, %238 : vector<24x1xf32>
    %cst_87 = arith.constant 1.000000e+00 : f32
    %240 = vector.broadcast %cst_87 : f32 to vector<24x1xf32>
    %241 = arith.subf %240, %211 : vector<24x1xf32>
    %242 = arith.addf %239, %241 : vector<24x1xf32>
    %243 = vector.broadcast %233 : vector<24x1xf32> to vector<24x128xf32>
    %244 = arith.mulf %216, %243 : vector<24x128xf32>
    %245 = vector.broadcast %233 : vector<24x1xf32> to vector<24x128xf32>
    %246 = arith.mulf %228, %245 : vector<24x128xf32>
    %247 = vector.broadcast %233 : vector<24x1xf32> to vector<24x128xf32>
    %248 = arith.mulf %200, %247 : vector<24x128xf32>
    %249 = vector.broadcast %233 : vector<24x1xf32> to vector<24x128xf32>
    %250 = arith.mulf %226, %249 : vector<24x128xf32>
    %251 = vector.broadcast %242 : vector<24x1xf32> to vector<24x128xf32>
    %252 = arith.mulf %216, %251 : vector<24x128xf32>
    %253 = vector.broadcast %242 : vector<24x1xf32> to vector<24x128xf32>
    %254 = arith.mulf %228, %253 : vector<24x128xf32>
    %255 = vector.broadcast %242 : vector<24x1xf32> to vector<24x128xf32>
    %256 = arith.mulf %200, %255 : vector<24x128xf32>
    %257 = vector.broadcast %242 : vector<24x1xf32> to vector<24x128xf32>
    %258 = arith.mulf %226, %257 : vector<24x128xf32>
    %259 = arith.truncf %216 : vector<24x128xf32> to vector<24x128xbf16>
    %260 = arith.truncf %228 : vector<24x128xf32> to vector<24x128xbf16>
    %261 = arith.truncf %200 : vector<24x128xf32> to vector<24x128xbf16>
    %262 = arith.truncf %226 : vector<24x128xf32> to vector<24x128xbf16>
    %263 = arith.truncf %244 : vector<24x128xf32> to vector<24x128xbf16>
    %264 = arith.truncf %246 : vector<24x128xf32> to vector<24x128xbf16>
    %265 = arith.truncf %248 : vector<24x128xf32> to vector<24x128xbf16>
    %266 = arith.truncf %250 : vector<24x128xf32> to vector<24x128xbf16>
    %267 = arith.truncf %252 : vector<24x128xf32> to vector<24x128xbf16>
    %268 = arith.truncf %254 : vector<24x128xf32> to vector<24x128xbf16>
    %269 = arith.truncf %256 : vector<24x128xf32> to vector<24x128xbf16>
    %270 = arith.truncf %258 : vector<24x128xf32> to vector<24x128xbf16>
    %271 = tpu.concatenate %259, %260, %261, %262, %263, %264, %265, %266, %267, %268, %269, %270 in 1 : vector<24x128xbf16>, vector<24x128xbf16>, vector<24x128xbf16>, vector<24x128xbf16>, vector<24x128xbf16>, vector<24x128xbf16>, vector<24x128xbf16>, vector<24x128xbf16>, vector<24x128xbf16>, vector<24x128xbf16>, vector<24x128xbf16>, vector<24x128xbf16> -> vector<24x1536xbf16>
    %c0_88 = arith.constant 0 : index
    %c0_89 = arith.constant 0 : index
    %272 = vector.load %arg6[%c0_88, %c0_89] : memref<1536x128xbf16, #tpu.memory_space<vmem>>, vector<1536x128xbf16>
    %cst_90 = arith.constant dense<0.000000e+00> : vector<24x128xf32>
    %273 = tpu.matmul %271, %272, %cst_90 {dimension_numbers = #tpu.dot_dimension_numbers<[1], [0], [0], [1], [0, 0, 1, 1], [], []>} : vector<24x1536xbf16>, vector<1536x128xbf16>, vector<24x128xf32> -> vector<24x128xf32>
    %c0_91 = arith.constant 0 : index
    %c0_92 = arith.constant 0 : index
    %274 = vector.load %arg7[%c0_91, %c0_92] : memref<1x128xf32, #tpu.memory_space<vmem>>, vector<1x128xf32>
    %275 = vector.broadcast %274 : vector<1x128xf32> to vector<24x128xf32>
    %276 = arith.addf %273, %275 : vector<24x128xf32>
    %c0_93 = arith.constant 0 : index
    %c0_94 = arith.constant 0 : index
    %277 = vector.load %arg8[%c0_93, %c0_94] : memref<1x128xf32, #tpu.memory_space<vmem>>, vector<1x128xf32>
    %278 = vector.broadcast %277 : vector<1x128xf32> to vector<24x128xf32>
    %279 = arith.mulf %276, %278 : vector<24x128xf32>
    %c0_95 = arith.constant 0 : index
    %c0_96 = arith.constant 0 : index
    %280 = vector.load %arg9[%c0_95, %c0_96] : memref<1x128xf32, #tpu.memory_space<vmem>>, vector<1x128xf32>
    %281 = vector.broadcast %280 : vector<1x128xf32> to vector<24x128xf32>
    %282 = arith.addf %279, %281 : vector<24x128xf32>
    %cst_97 = arith.constant 0.000000e+00 : f32
    %283 = vector.broadcast %cst_97 : f32 to vector<24x128xf32>
    %284 = arith.maximumf %282, %283 : vector<24x128xf32>
    %285 = arith.addf %284, %0 : vector<24x128xf32>
    %c0_98 = arith.constant 0 : index
    %c0_99 = arith.constant 0 : index
    %286 = vector.load %arg10[%c0_98, %c0_99] : memref<24x128xf32, #tpu.memory_space<vmem>>, vector<24x128xf32>
    tpu.vector_store %arg10[%c0_98, %c0_99], %285 {strides = array<i32>} : memref<24x128xf32, #tpu.memory_space<vmem>>, vector<24x128xf32>,
    return
  }
  func.func @transform_0(%arg0: i32) -> (i32, i32) {
    %c0_i32 = arith.constant 0 : i32
    %c0_i32_0 = arith.constant 0 : i32
    return %arg0, %c0_i32 : i32, i32
  }
  func.func @transform_1(%arg0: i32) -> (i32, i32, i32) {
    %c0_i32 = arith.constant 0 : i32
    %c0_i32_0 = arith.constant 0 : i32
    %c0_i32_1 = arith.constant 0 : i32
    return %c0_i32, %arg0, %c0_i32_0 : i32, i32, i32
  }
  func.func @transform_2(%arg0: i32) -> (i32, i32, i32) {
    %c0_i32 = arith.constant 0 : i32
    %c0_i32_0 = arith.constant 0 : i32
    %c0_i32_1 = arith.constant 0 : i32
    return %c0_i32, %arg0, %c0_i32_0 : i32, i32, i32
  }
  func.func @transform_3(%arg0: i32) -> (i32, i32) {
    %c0_i32 = arith.constant 0 : i32
    %c0_i32_0 = arith.constant 0 : i32
    return %arg0, %c0_i32 : i32, i32
  }
  func.func @transform_4(%arg0: i32) -> i32 {
    %c0_i32 = arith.constant 0 : i32
    %c0_i32_0 = arith.constant 0 : i32
    return %c0_i32 : i32
  }
  func.func @transform_5(%arg0: i32) -> (i32, i32) {
    %c0_i32 = arith.constant 0 : i32
    %c0_i32_0 = arith.constant 0 : i32
    %c0_i32_1 = arith.constant 0 : i32
    return %c0_i32, %c0_i32_0 : i32, i32
  }
  func.func @transform_6(%arg0: i32) -> (i32, i32) {
    %c0_i32 = arith.constant 0 : i32
    %c0_i32_0 = arith.constant 0 : i32
    %c0_i32_1 = arith.constant 0 : i32
    return %c0_i32, %c0_i32_0 : i32, i32
  }
  func.func @transform_7(%arg0: i32) -> (i32, i32) {
    %c0_i32 = arith.constant 0 : i32
    %c0_i32_0 = arith.constant 0 : i32
    %c0_i32_1 = arith.constant 0 : i32
    return %c0_i32, %c0_i32_0 : i32, i32
  }
  func.func @transform_8(%arg0: i32) -> (i32, i32) {
    %c0_i32 = arith.constant 0 : i32
    %c0_i32_0 = arith.constant 0 : i32
    %c0_i32_1 = arith.constant 0 : i32
    return %c0_i32, %c0_i32_0 : i32, i32
  }
  func.func @transform_9(%arg0: i32) -> (i32, i32) {
    %c0_i32 = arith.constant 0 : i32
    %c0_i32_0 = arith.constant 0 : i32
    return %arg0, %c0_i32 : i32, i32
  }
}

</mosaic_0001>

<bundles_post_ra>
// kernel: tpu_custom_call.1
= control target key start
LH: loop header
LB: loop body
LE: loop exit
PB: predicated region body
PF: predicated region fallthrough
CT: control target
= control target key end

     0   :  { %14 = vsyncpa [#allocation3], 0  ;;  %s3352_s0 = inlined_call_operand.vmem [shape: f32[24,128], index: 0, kind: input, shape index: {}]   ;;  %s3353_s1 = inlined_call_operand.hbm [shape: f32[8,24,128], index: 1, kind: input, shape index: {}]   ;;  %s3354_s2 = inlined_call_operand.hbm [shape: f32[8,24,128], index: 2, kind: input, shape index: {}]   ;;  %s3355_s3 = inlined_call_operand.vmem [shape: f32[24,1], index: 3, kind: input, shape index: {}]   ;;  %s3356_s4 = inlined_call_operand.vmem [shape: f32[2], index: 4, kind: input, shape index: {}]   ;;  %s3357_s5 = inlined_call_operand.hbm [shape: bf16[1536,128], index: 5, kind: input, shape index: {}]   ;;  %s3358_s6 = inlined_call_operand.vmem [shape: f32[1,128], index: 6, kind: input, shape index: {}]   ;;  %s3359_s7 = inlined_call_operand.vmem [shape: f32[1,128], index: 7, kind: input, shape index: {}]   ;;  %s3360_s8 = inlined_call_operand.vmem [shape: f32[1,128], index: 8, kind: input, shape index: {}]   ;;  %s3361_s9 = inlined_call_operand.hbm [shape: f32[24,128], index: 9, kind: output, shape index: {}]  }
   0x1   :  { %15 = vsyncpa [#allocation7], 0 }
   0x2   :  { %16 = vsyncpa [#allocation5], 0 }
   0x3   :  { %17 = vsyncpa [#allocation4], 0  ;;  %s2656_s30 = smov [#allocation6]   ;;  %s2657_s11 = smov [#allocation2]  }
   0x4   :  { %s37_s10 = sshll.u32 %s2656_s30, 4  ;;  %s25_s12 = sshll.u32 %s2657_s11, 4  ;;  %s38_s10 = int_to_ptr.vmem [resolvable:$true] %s37_s10  ;;  %s2717_s12 = int_to_ptr.vmem [resolvable:$true] %s25_s12 }
   0x5   :  { %s2546_s15 = scalar_lea.hbm %s3354_s2, 3072 }
   0x6   :  { %p2547_p0 = scmp.ne.s32.totalorder %s3354_s2, %s2546_s15  ;;  %p2550_p1 = scmp.lt.u32.totalorder %s2546_s15, %s3354_s2 }
   0x8   :  { %p2552_p2 = pnand %p2550_p1, %p2547_p0 }
   0xa   :  { %2555 = shalt.err (!%p2552_p2)
}
   0xb   :  { %s2556_s20 = scalar_lea.vmem %s38_s10, 3072  ;;  %p2561_p4 = scmp.lt.s32.totalorder %s38_s10, %s38_s10 }
   0xc   :  { %p2557_p3 = scmp.ne.s32.totalorder %s38_s10, %s2556_s20  ;;  %p2562_p5 = scmp.lt.s32.totalorder %s2556_s20, %s2556_s20 }
   0xe   :  { %p2563_p6 = por %p2562_p5, %p2561_p4 }
  0x10   :  { %p2564_p7 = pnand %p2563_p6, %p2557_p3 }
  0x12   :  { %2567 = shalt.err (!%p2564_p7)
}
  0x13   :  { %s2658_s21 = smov 128   ;;  %s2659_s22 = smov 8  }
  0x14   :  { %43 = dma.hbm_to_vmem [thread:$0]  %s3354_s2, 3072, %s38_s10, [#allocation7], %s2658_s21, %s2658_s21, %s2659_s22  }
  0x15   :  { %s2568_s27 = scalar_lea.hbm %s3353_s1, 3072 }
  0x16   :  { %p2569_p8 = scmp.ne.s32.totalorder %s3353_s1, %s2568_s27  ;;  %p2572_p9 = scmp.lt.u32.totalorder %s2568_s27, %s3353_s1 }
  0x18   :  { %p2574_p10 = pnand %p2572_p9, %p2569_p8 }
  0x1a   :  { %2577 = shalt.err (!%p2574_p10)
}
  0x1b   :  { %s2578_s13 = scalar_lea.vmem %s2717_s12, 3072  ;;  %p2583_p12 = scmp.lt.s32.totalorder %s2717_s12, %s2717_s12 }
  0x1c   :  { %p2579_p11 = scmp.ne.s32.totalorder %s2717_s12, %s2578_s13  ;;  %p2584_p13 = scmp.lt.s32.totalorder %s2578_s13, %s2578_s13 }
  0x1e   :  { %p2585_p0 = por %p2584_p13, %p2583_p12 }
  0x20   :  { %p2586_p1 = pnand %p2585_p0, %p2579_p11 }
  0x22   :  { %2589 = shalt.err (!%p2586_p1)
}
  0x23   :  { %31 = dma.hbm_to_vmem [thread:$0]  %s3353_s1, 3072, %s2717_s12, [#allocation3], %s2658_s21, %s2658_s21, %s2659_s22  }
  0x24   :  { %s52_s16 = sshll.u32 %s3356_s4, 4  ;;  %s53_s16 = int_to_ptr.vmem [resolvable:$true] %s52_s16 }
  0x25   :  { %s2590_s17 = scalar_lea.vmem %s53_s16, 16  ;;  %p2595_p3 = scmp.lt.s32.totalorder %s53_s16, %s53_s16 }
  0x26   :  { %p2591_p2 = scmp.ne.s32.totalorder %s53_s16, %s2590_s17  ;;  %p2596_p4 = scmp.lt.s32.totalorder %s2590_s17, %s2590_s17 }
  0x28   :  { %p2597_p5 = por %p2596_p4, %p2595_p3 }
  0x2a   :  { %p2598_p6 = pnand %p2597_p5, %p2591_p2 }
  0x2c   :  { %2601 = shalt.err (!%p2598_p6)
}
  0x2d   :  { %s2660_s18 = smov [#allocation8]   ;;  %s2661_s19 = smov [#allocation9]  }
  0x2e   :  { %55 = dma.vmem_to_smem %s53_s16, 16, %s2660_s18, [#allocation5]  }
  0x2f   :  { %s61_s20 = sshll.u32 %s2661_s19, 4  ;;  %s2602_s1 = scalar_lea.hbm %s3357_s5, 12288  ;;  %s62_s20 = int_to_ptr.vmem [resolvable:$true] %s61_s20 }
  0x30   :  { %p2603_p7 = scmp.ne.s32.totalorder %s3357_s5, %s2602_s1  ;;  %p2606_p8 = scmp.lt.u32.totalorder %s2602_s1, %s3357_s5 }
  0x32   :  { %p2608_p9 = pnand %p2606_p8, %p2603_p7 }
  0x34   :  { %2611 = shalt.err (!%p2608_p9)
}
  0x35   :  { %s2612_s27 = scalar_lea.vmem %s62_s20, 12288  ;;  %p2617_p11 = scmp.lt.s32.totalorder %s62_s20, %s62_s20 }
  0x36   :  { %p2613_p10 = scmp.ne.s32.totalorder %s62_s20, %s2612_s27  ;;  %p2618_p12 = scmp.lt.s32.totalorder %s2612_s27, %s2612_s27 }
  0x38   :  { %p2619_p13 = por %p2618_p12, %p2617_p11 }
  0x3a   :  { %p2620_p0 = pnand %p2619_p13, %p2613_p10 }
  0x3c   :  { %2623 = shalt.err (!%p2620_p0)
}
  0x3d   :  { %s2662_s28 = smov 64   ;;  %s2663_s29 = smov 4  }
  0x3e   :  { %67 = dma.hbm_to_vmem [thread:$0]  %s3357_s5, 12288, %s62_s20, [#allocation7], %s2662_s28, %s2662_s28, %s2663_s29  }
  0x3f   :  { %2646 = dma.done.wait [#allocation3], 3072  }
  0x40   :  { %2647 = vsyncadd [#allocation3], 4294964224 }
  0x41   :  { %2648 = dma.done.wait [#allocation7], 3072  }
  0x42   :  { %2649 = vsyncadd [#allocation7], 4294964224 }
  0x43   :  { %2650 = dma.done.wait [#allocation5], 16  }
  0x44   :  { %2651 = vsyncadd [#allocation5], 4294967280 }
  0x45   :  { %2652 = dma.done.wait [#allocation7], 12288  }
  0x46   :  { %2653 = vsyncadd [#allocation7], 4294955008 }
  0x47   :  { %86 = sfence }
  0x48   :  { %v2772_v0 = vld [vmem:[%s3355_s3] sm:$0xff]  ;;  %v2777_v1 = vld [vmem:[%s3355_s3 + $0x8] sm:$0xff]  ;;  %v2664_v2 = vmov 0   ;;  %v2665_v3 = vmov 0.0   ;;  %v2852_v37 = vld [vmem:[%s3355_s3 + $0x10] sm:$0xff]  ;;  %s2868_s3 = sld [smem:[#allocation8 + $0x1]] }
  0x49   :  { %2368 = vset.pattern.permute.xlu1 %v2664_v2  ;;  %2357 = vset.pattern.permute.xlu0 %v2664_v2  ;;  %vm260_vm0 = vcmp.ge.f32.partialorder %v2772_v0, 3.0  ;;  %vm261_vm1 = vcmp.ge.f32.partialorder %v2777_v1, 3.0  ;;  %vm96_vm2 = vcmp.ge.f32.partialorder %v2772_v0, 1.0  ;;  %vm97_vm3 = vcmp.ge.f32.partialorder %v2777_v1, 1.0  ;;  %v2424_v44 = vld [vmem:[#allocation9 + $0xc0] sm:$0xff]   ;;  %v2426_v52 = vld [vmem:[#allocation9 + $0xc8] sm:$0xff]  }
  0x4a   :  { %v2784_v4 = vsel %vm260_vm0, 1.0, %v2665_v3  ;;  %v2787_v5 = vsel %vm261_vm1, 1.0, %v2665_v3  ;;  %v2052_v6 = vsel %vm96_vm2, 1.0, %v2665_v3  ;;  %v2053_v7 = vsel %vm97_vm3, 1.0, %v2665_v3  ;;  %v2425_v47 = vld [vmem:[#allocation9 + $0x80] sm:$0xff]   ;;  %2206 = vmatprep.subr.bf16.mxu1 %v2424_v44  ;;  %v2427_v56 = vld [vmem:[#allocation9 + $0x88] sm:$0xff]  }
  0x4b   :  { %v2369_v8 = vpack.i.bf16 %v2787_v5, %v2784_v4  ;;  %v2358_v9 = vpack.i.bf16 %v2053_v7, %v2052_v6  ;;  %vm343_vm4 = vcmp.ge.f32.partialorder %v2772_v0, 4.0  ;;  %vm344_vm5 = vcmp.ge.f32.partialorder %v2777_v1, 4.0  ;;  %2207 = vmatpush3.bf16.msra.mxu1 %v2425_v47  ;;  %v2428_v57 = vld [vmem:[#allocation9 + $0xd0] sm:$0xff]   ;;  %v2430_v2 = vld [vmem:[#allocation9 + $0xd8] sm:$0xff]   ;;  %s2894_s16 = sld [smem:[#allocation8]]  ;;  %s2666_s29 = smov [#allocation10]  }
  0x4c   :  { %v2796_v10 = vsel %vm343_vm4, 1.0, %v2665_v3  ;;  %v2799_v11 = vsel %vm344_vm5, 1.0, %v2665_v3  ;;  %vm177_vm6 = vcmp.ge.f32.partialorder %v2772_v0, 2.0  ;;  %vm178_vm7 = vcmp.ge.f32.partialorder %v2777_v1, 2.0  ;;  %2208 = vmatprep.subr.bf16.mxu1 %v2426_v52  ;;  %v2429_v58 = vld [vmem:[#allocation9 + $0x90] sm:$0xff]   ;;  %v2446_v52 = vld [vmem:[#allocation9 + $0x58] sm:$0xff]  }
  0x4d   :  { %2370 = vperm.xlu1 %2368, %v2369_v8   ;;  %2359 = vperm.xlu0 %2357, %v2358_v9   ;;  %v2374_v12 = vpack.i.bf16 %v2799_v11, %v2796_v10  ;;  %v2055_v13 = vsel %vm177_vm6, 1.0, %v2665_v3  ;;  %v2056_v14 = vsel %vm178_vm7, 1.0, %v2665_v3  ;;  %vm509_vm8 = vcmp.ge.f32.partialorder %v2772_v0, 6.0  ;;  %v2442_v44 = vld [vmem:[#allocation9 + $0x50] sm:$0xff]   ;;  %s2037_s30 = sshll.u32 %s2666_s29, 4  ;;  %s2038_s30 = int_to_ptr.vmem [resolvable:$true] %s2037_s30 }
  0x4e   :  { %v2363_v15 = vpack.i.bf16 %v2056_v14, %v2055_v13  ;;  %vm510_vm9 = vcmp.ge.f32.partialorder %v2777_v1, 6.0  ;;  %v2810_v16 = vsel %vm509_vm8, 1.0, %v2665_v3  ;;  %vm426_vm10 = vcmp.ge.f32.partialorder %v2772_v0, 5.0  ;;  %s2624_s11 = scalar_lea.vmem %s2038_s30, 384  ;;  %p2629_p2 = scmp.lt.s32.totalorder %s2038_s30, %s2038_s30 }
  0x4f   :  { %v2814_v17 = vsel %vm510_vm9, 1.0, %v2665_v3  ;;  %vm427_vm11 = vcmp.ge.f32.partialorder %v2777_v1, 5.0  ;;  %v2818_v18 = vsel %vm426_vm10, 1.0, %v2665_v3  ;;  %vm675_vm12 = vcmp.ge.f32.partialorder %v2772_v0, 8.0  ;;  %2209 = vmatpush3.bf16.msra.mxu1 %v2427_v56  ;;  %p2625_p1 = scmp.ne.s32.totalorder %s2038_s30, %s2624_s11  ;;  %p2630_p3 = scmp.lt.s32.totalorder %s2624_s11, %s2624_s11 }
  0x50   :  { %v2384_v19 = vpack.i.bf16 %v2814_v17, %v2810_v16  ;;  %v2824_v20 = vsel %vm427_vm11, 1.0, %v2665_v3  ;;  %vm676_vm13 = vcmp.ge.f32.partialorder %v2777_v1, 8.0  ;;  %v2828_v21 = vsel %vm675_vm12, 1.0, %v2665_v3  ;;  %2210 = vmatprep.subr.bf16.mxu1 %v2428_v57 }
  0x51   :  { %2375 = vperm.xlu1 %2368, %v2374_v12   ;;  %2364 = vperm.xlu0 %2357, %v2363_v15   ;;  %v2379_v22 = vpack.i.bf16 %v2824_v20, %v2818_v18  ;;  %v2833_v23 = vsel %vm676_vm13, 1.0, %v2665_v3  ;;  %vm592_vm14 = vcmp.ge.f32.partialorder %v2772_v0, 7.0  ;;  %vm593_vm15 = vcmp.ge.f32.partialorder %v2777_v1, 7.0  ;;  %v2432_v12 = vld [vmem:[#allocation9 + $0xe0] sm:$0xff]   ;;  %p2631_p4 = por %p2630_p3, %p2629_p2 }
  0x52   :  { %v2838_v24 = vsel %vm592_vm14, 1.0, %v2665_v3  ;;  %v2841_v25 = vsel %vm593_vm15, 1.0, %v2665_v3  ;;  %v768_v26 = vmax.f32 %v2777_v1, 1.0  ;;  %v767_v27 = vmax.f32 %v2772_v0, 1.0  ;;  %v2433_v15 = vld [vmem:[#allocation9 + $0xa0] sm:$0xff]  }
  0x53   :  { %v2394_v28 = vpack.i.bf16 %v2833_v23, %v2828_v21  ;;  %v2389_v29 = vpack.i.bf16 %v2841_v25, %v2838_v24  ;;  %v151_v30 = vsub.f32 1.0, %v2053_v7  ;;  %v150_v31 = vsub.f32 1.0, %v2052_v6  ;;  %2211 = vmatpush3.bf16.msra.mxu1 %v2429_v58  ;;  %v2448_v58 = vld [vmem:[#allocation9 + $0x60] sm:$0xff]   ;;  %p2632_p5 = pnand %p2631_p4, %p2625_p1 }
  0x54   :  { %2520 = vrcp.f32 %v768_v26  ;;  %v234_v36 = vsub.f32 1.0, %v2056_v14  ;;  %v233_v38 = vsub.f32 1.0, %v2055_v13  ;;  %vm677_vm0 = vcmp.ge.f32.partialorder %v2852_v37, 8.0  ;;  %2212 = vmatprep.subr.bf16.mxu1 %v2430_v2 }
  0x55   :  { %2385 = vperm.xlu1 %2368, %v2384_v19   ;;  %2380 = vperm.xlu0 %2357, %v2379_v22   ;;  %2522 = vrcp.f32 %v767_v27  ;;  %v154_v33 = vmul.f32 1e+30, %v151_v30  ;;  %v153_v35 = vmul.f32 1e+30, %v150_v31  ;;  %vm759_vm1 = vcmp.gt.f32.partialorder %v2777_v1, 0.0  ;;  %v2435_v19 = vld [vmem:[#allocation9] sm:$0xff]  }
  0x56   :  { %v2857_v39 = vsel %vm677_vm0, 1.0, %v2665_v3  ;;  %v2860_v40 = vsel %vm759_vm1, 1.0, %v2665_v3  ;;  %v317_v41 = vsub.f32 1.0, %v2787_v5  ;;  %v316_v42 = vsub.f32 1.0, %v2784_v4  ;;  %v2431_v5 = vld [vmem:[#allocation9 + $0x98] sm:$0xff]   ;;  %v2438_v31 = vld [vmem:[#allocation9 + $0x48] sm:$0xff]  }
  0x57   :  { %v2419_v43 = vpack.i.bf16 %v2857_v39, %v2860_v40  ;;  %v237_v45 = vmul.f32 1e+30, %v234_v36  ;;  %v400_v46 = vsub.f32 1.0, %v2799_v11  ;;  %v236_v48 = vmul.f32 1e+30, %v233_v38  ;;  %2213 = vmatpush3.bf16.msra.mxu1 %v2431_v5  ;;  %v2440_v36 = vld [vmem:[#allocation9 + $0xf0] sm:$0xff]  }
  0x58   :  { %v399_v49 = vsub.f32 1.0, %v2796_v10  ;;  %v320_v50 = vmul.f32 1e+30, %v317_v41  ;;  %v319_v51 = vmul.f32 1e+30, %v316_v42  ;;  %v482_v54 = vsub.f32 1.0, %v2818_v18  ;;  %2214 = vmatprep.subr.bf16.mxu1 %v2432_v12 }
  0x59   :  { %2395 = vperm.xlu1 %2368, %v2394_v28   ;;  %2390 = vperm.xlu0 %2357, %v2389_v29   ;;  %v403_v53 = vmul.f32 1e+30, %v400_v46  ;;  %vm98_vm2 = vcmp.ge.f32.partialorder %v2852_v37, 1.0  ;;  %vm179_vm3 = vcmp.ge.f32.partialorder %v2852_v37, 2.0  ;;  %vm262_vm4 = vcmp.ge.f32.partialorder %v2852_v37, 3.0  ;;  %v2434_v18 = vld [vmem:[#allocation9 + $0x40] sm:$0xff]  }
  0x5a   :  { %v402_v55 = vmul.f32 1e+30, %v399_v49  ;;  %vm345_vm5 = vcmp.ge.f32.partialorder %v2852_v37, 4.0  ;;  %v485_v59 = vmul.f32 1e+30, %v482_v54  ;;  %v2876_v60 = vsel %vm98_vm2, 1.0, %v2665_v3  ;;  %2178 = vmatprep.subr.bf16.mxu0 %v2434_v18 }
  0x5b   :  { %v2057_v61 = vsel %vm179_vm3, 1.0, %v2665_v3  ;;  %v2880_v62 = vsel %vm262_vm4, 1.0, %v2665_v3  ;;  %v2883_v63 = vsel %vm345_vm5, 1.0, %v2665_v3  ;;  %v483_v4 = vsub.f32 1.0, %v2824_v20  ;;  %2215 = vmatpush3.bf16.msra.mxu1 %v2433_v15  ;;  %2179 = vmatpush3.bf16.msra.mxu0 %v2435_v19  ;;  %v2436_v28 = vld [vmem:[#allocation9 + $0xe8] sm:$0xff]   ;;  %v2441_v41 = vld [vmem:[#allocation9 + $0xb0] sm:$0xff]  }
  0x5c   :  { %v2399_v6 = vpack.i.bf16 %v2057_v61, %v2876_v60  ;;  %v566_v7 = vsub.f32 1.0, %v2814_v17  ;;  %v565_v8 = vsub.f32 1.0, %v2810_v16  ;;  %v649_v9 = vsub.f32 1.0, %v2841_v25  ;;  %v2437_v29 = vld [vmem:[#allocation9 + $0xa8] sm:$0xff]   ;;  %2216 = vmatprep.subr.bf16.mxu1 %v2436_v28  ;;  %2180 = vmatprep.subr.bf16.mxu0 %v2438_v31  ;;  %v2443_v46 = vld [vmem:[#allocation9 + $0x10] sm:$0xff]   ;;  %v2455_v18 = vld [vmem:[#allocation9 + $0x38] sm:$0xff]  }
  0x5d   :  { %v648_v10 = vsub.f32 1.0, %v2838_v24  ;;  %v731_v11 = vsub.f32 1.0, %v2828_v21  ;;  %v2404_v13 = vpack.i.bf16 %v2883_v63, %v2880_v62  ;;  %v486_v14 = vmul.f32 1e+30, %v483_v4  ;;  %v2456_v19 = vld [vmem:[#allocation9 + $0x140] sm:$0xff]  }
  0x5e   :  { %v2521_v32 = vpop.eup %2520  ;;  %v569_v17 = vmul.f32 1e+30, %v566_v7  ;;  %v568_v16 = vmul.f32 1e+30, %v565_v8  ;;  %v652_v20 = vmul.f32 1e+30, %v649_v9 }
  0x5f   :  { %v2523_v34 = vpop.eup %2522  ;;  %780 = vperm.xlu1 %2368, %v2521_v32   ;;  %v651_v22 = vmul.f32 1e+30, %v648_v10  ;;  %vm428_vm6 = vcmp.ge.f32.partialorder %v2852_v37, 5.0  ;;  %v831_v21 = vadd.f32 1.0, %v2777_v1  ;;  %v734_v24 = vmul.f32 1e+30, %v731_v11  ;;  %2217 = vmatpush3.bf16.msra.mxu1 %v2437_v29 }
  0x60   :  { %775 = vperm.xlu0 %2357, %v2523_v34   ;;  %v732_v25 = vsub.f32 1.0, %v2833_v23  ;;  %v235_v26 = vsub.f32 1.0, %v2057_v61  ;;  %v830_v27 = vadd.f32 1.0, %v2772_v0  ;;  %vm511_vm7 = vcmp.ge.f32.partialorder %v2852_v37, 6.0  ;;  %v2439_v23 = vld [vmem:[#allocation9 + $0x8] sm:$0xff]   ;;  %2218 = vmatprep.subr.bf16.mxu1 %v2440_v36  ;;  %v2452_v11 = vld [vmem:[#allocation9 + $0x70] sm:$0xff]  }
  0x61   :  { %v832_v30 = vadd.f32 1.0, %v2852_v37  ;;  %v2905_v1 = vsel %vm428_vm6, 1.0, %v2665_v3  ;;  %vm594_vm8 = vcmp.ge.f32.partialorder %v2852_v37, 7.0  ;;  %vm758_vm9 = vcmp.gt.f32.partialorder %v2772_v0, 0.0  ;;  %2181 = vmatpush3.bf16.msra.mxu0 %v2439_v23  ;;  %v2445_v0 = vld [vmem:[#allocation9 + $0xb8] sm:$0xff]   ;;  %v2451_v8 = vld [vmem:[#allocation9 + $0x28] sm:$0xff]  }
  0x62   :  { %2524 = vlog2.f32 %v831_v21  ;;  %v735_v32 = vmul.f32 1e+30, %v732_v25  ;;  %v2910_v34 = vmul.f32 1e+30, %v235_v26  ;;  %v2918_v38 = vsel %vm594_vm8, 1.0, %v2665_v3  ;;  %2182 = vmatprep.subr.bf16.mxu0 %v2442_v44 }
  0x63   :  { %163 = vperm.xlu1 %2368, %v154_v33   ;;  %v769_v33 = vmax.f32 %v2852_v37, 1.0  ;;  %2526 = vlog2.f32 %v830_v27  ;;  %v2923_v42 = vsel %vm758_vm9, 1.0, %v2665_v3  ;;  %2219 = vmatpush3.bf16.msra.mxu1 %v2441_v41  ;;  %v401_v47 = vsub.f32 1.0, %v2883_v63 }
  0x64   :  { %158 = vperm.xlu0 %2357, %v153_v35   ;;  %v2069_v35 = vsel %vm511_vm7, 1.0, %v2665_v3  ;;  %2528 = vlog2.f32 %v832_v30  ;;  %v484_v12 = vsub.f32 1.0, %v2905_v1  ;;  %v733_v15 = vsub.f32 1.0, %v2857_v39 }
  0x65   :  { %2530 = vrcp.f32 %v769_v33  ;;  %v2409_v49 = vpack.i.bf16 %v2069_v35, %v2905_v1  ;;  %2183 = vmatpush3.bf16.msra.mxu0 %v2443_v46  ;;  %v849_v25 = vstv %s2894_s16  ;;  %vm760_vm10 = vcmp.gt.f32.partialorder %v2852_v37, 0.0  ;;  %v271_v46 = vld [vmem:[#allocation2 + $0x38] sm:$0xff] }
  0x66   :  { %2184 = vmatprep.subr.bf16.mxu0 %v2446_v52  ;;  %v2078_v31 = vsel %vm760_vm10, 1.0, %v2665_v3  ;;  %v857_v1 = vsub.f32 1.0, %v2860_v40  ;;  %v856_v23 = vsub.f32 1.0, %v2923_v42  ;;  %v278_v52 = vld [vmem:[#allocation6 + $0x38] sm:$0xff] }
  0x67   :  { %246 = vperm.xlu1 %2368, %v237_v45   ;;  %v152_v45 = vsub.f32 1.0, %v2876_v60  ;;  %v404_v60 = vmul.f32 1e+30, %v401_v47  ;;  %v858_v36 = vsub.f32 1.0, %v2078_v31  ;;  %v105_v47 = vld [vmem:[#allocation2] sm:$0xff] }
  0x68   :  { %241 = vperm.xlu0 %2357, %v236_v48   ;;  %v2444_v48 = vld [vmem:[#allocation9 + $0xf8] sm:$0xff]  }
  0x69   :  { %2220 = vmatprep.subr.bf16.mxu1 %v2444_v48  ;;  %v155_v57 = vmul.f32 1e+30, %v152_v45  ;;  %v270_v45 = vld [vmem:[#allocation2 + $0x30] sm:$0xff]  ;;  %v106_v48 = vld [vmem:[#allocation2 + $0x8] sm:$0xff] }
  0x6a   :  { %2221 = vmatpush3.bf16.msra.mxu1 %v2445_v0  ;;  %v277_v0 = vld [vmem:[#allocation6 + $0x30] sm:$0xff] }
  0x6b   :  { %329 = vperm.xlu1 %2368, %v320_v50   ;;  %v318_v50 = vsub.f32 1.0, %v2880_v62 }
  0x6c   :  { %324 = vperm.xlu0 %2357, %v319_v51   ;;  %v567_v51 = vsub.f32 1.0, %v2069_v35  ;;  %v2525_v54 = vpop.eup %2524 }
  0x6d   :  { %v2527_v56 = vpop.eup %2526  ;;  %v321_v61 = vmul.f32 1e+30, %v318_v50  ;;  %v2931_v2 = vmul.f32 0.6931472, %v2525_v54  ;;  %v354_v50 = vld [vmem:[#allocation2 + $0x50] sm:$0xff]  ;;  %v111_v54 = vld [vmem:[#allocation6] sm:$0xff] }
  0x6e   :  { %v570_v62 = vmul.f32 1e+30, %v567_v51  ;;  %v2529_v63 = vpop.eup %2528  ;;  %v834_v4 = vmul.f32 0.6931472, %v2527_v56  ;;  %v187_v51 = vld [vmem:[#allocation2 + $0x18] sm:$0xff] }
  0x6f   :  { %412 = vperm.xlu1 %2368, %v403_v53   ;;  %v2447_v53 = vld [vmem:[#allocation9 + $0x18] sm:$0xff]   ;;  %v2531_v5 = vpop.eup %2530  ;;  %v838_v7 = vmul.f32 0.6931472, %v2529_v63  ;;  %v844_v9 = vmax.f32 %v2931_v2, 1e-12  ;;  %v520_v63 = vld [vmem:[#allocation2 + $0x80] sm:$0xff] }
  0x70   :  { %407 = vperm.xlu0 %2357, %v402_v55   ;;  %v2414_v55 = vpack.i.bf16 %v2923_v42, %v2918_v38  ;;  %2185 = vmatpush3.bf16.msra.mxu0 %v2447_v53  ;;  %v843_v10 = vmax.f32 %v834_v4, 1e-12  ;;  %v519_v56 = vld [vmem:[#allocation2 + $0x78] sm:$0xff] }
  0x71   :  { %2186 = vmatprep.subr.bf16.mxu0 %v2448_v58  ;;  %2532 = vrcp.f32 %v844_v9  ;;  %v112_v58 = vld [vmem:[#allocation6 + $0x8] sm:$0xff] }
  0x72   :  { %2534 = vrcp.f32 %v843_v10  ;;  %v526_v10 = vld [vmem:[#allocation6 + $0x78] sm:$0xff] }
  0x73   :  { %490 = vperm.xlu1 %2368, %v485_v59   ;;  %v2449_v59 = vld [vmem:[#allocation9 + $0x20] sm:$0xff]  }
  0x74   :  { %2400 = vperm.xlu0 %2357, %v2399_v6   ;;  %2187 = vmatpush3.bf16.msra.mxu0 %v2449_v59  ;;  %v2450_v6 = vld [vmem:[#allocation9 + $0x68] sm:$0xff]  }
  0x75   :  { %2188 = vmatprep.subr.bf16.mxu0 %v2450_v6  ;;  %v194_v6 = vld [vmem:[#allocation6 + $0x18] sm:$0xff] }
  0x77   :  { %2405 = vperm.xlu1 %2368, %v2404_v13   ;;  %v845_v13 = vmax.f32 %v838_v7, 1e-12 }
  0x78   :  { %495 = vperm.xlu0 %2357, %v486_v14   ;;  %2189 = vmatpush3.bf16.msra.mxu0 %v2451_v8  ;;  %v2453_v14 = vld [vmem:[#allocation9 + $0x30] sm:$0xff]   ;;  %v195_v8 = vld [vmem:[#allocation6 + $0x20] sm:$0xff] }
  0x79   :  { %2190 = vmatprep.subr.bf16.mxu0 %v2452_v11  ;;  %2536 = vrcp.f32 %v845_v13  ;;  %v437_v11 = vld [vmem:[#allocation2 + $0x68] sm:$0xff] }
  0x7b   :  { %578 = vperm.xlu1 %2368, %v569_v17   ;;  %v2454_v17 = vld [vmem:[#allocation9 + $0x78] sm:$0xff]   ;;  %v2533_v39 = vpop.eup %2532 }
  0x7c   :  { %573 = vperm.xlu0 %2357, %v568_v16   ;;  %2191 = vmatpush3.bf16.msra.mxu0 %v2453_v14  ;;  %v650_v16 = vsub.f32 1.0, %v2918_v38  ;;  %v2535_v26 = vpop.eup %2534  ;;  %v851_v28 = vmul.f32 %v2533_v39, %v849_v25 }
  0x7d   :  { %2192 = vmatprep.subr.bf16.mxu0 %v2454_v17  ;;  %v850_v29 = vmul.f32 %v2535_v26, %v849_v25  ;;  %v443_v26 = vld [vmem:[#allocation6 + $0x60] sm:$0xff] }
  0x7e   :  { %v653_v21 = vmul.f32 1e+30, %v650_v16  ;;  %v854_v33 = vmul.f32 %v2860_v40, %v851_v28  ;;  %v2953_v40 = vld [vmem:[%s3352_s0] sm:$0xff] }
  0x7f   :  { %661 = vperm.xlu1 %2368, %v652_v20   ;;  %v2457_v20 = vld [vmem:[#allocation9 + $0x1c0] sm:$0xff]   ;;  %v853_v35 = vmul.f32 %v2923_v42, %v850_v29  ;;  %v2958_v42 = vld [vmem:[%s3352_s0 + $0x8] sm:$0xff]  ;;  %v273_v53 = vadd.f32 %v270_v45, %v2953_v40  ;;  %v108_v59 = vadd.f32 %v105_v47, %v2953_v40  ;;  %v190_v9 = vadd.f32 %v187_v51, %v2953_v40 }
  0x80   :  { %656 = vperm.xlu0 %2357, %v651_v22   ;;  %2193 = vmatpush3.bf16.msra.mxu0 %v2455_v18  ;;  %v736_v22 = vmul.f32 1e+30, %v733_v15  ;;  %v860_v38 = vadd.f32 %v857_v1, %v854_v33  ;;  %v527_v15 = vld [vmem:[#allocation6 + $0x80] sm:$0xff]  ;;  %v522_v17 = vadd.f32 %v519_v56, %v2953_v40  ;;  %v523_v18 = vadd.f32 %v520_v63, %v2958_v42  ;;  %v692_v45 = vld [vmem:[#allocation6 + $0xa8] sm:$0xff] }
  0x81   :  { %2234 = vmatprep.subr.bf16.mxu0 %v2456_v19  ;;  %2262 = vmatprep.subr.bf16.mxu1 %v2457_v20  ;;  %v859_v3 = vadd.f32 %v856_v23, %v853_v35  ;;  %v114_v13 = vadd.f32 %v111_v54, %v108_v59  ;;  %v686_v19 = vld [vmem:[#allocation2 + $0xb0] sm:$0xff]  ;;  %v444_v23 = vld [vmem:[#allocation6 + $0x68] sm:$0xff] }
  0x82   :  { %v2977_v1 = vadd.f32 %v526_v10, %v522_v17  ;;  %v689_v35 = vadd.f32 %v686_v19, %v2958_v42 }
  0x83   :  { %739 = vperm.xlu1 %2368, %v734_v24   ;;  %v839_v24 = vstv %s2868_s3  ;;  %v2537_v30 = vpop.eup %2536 }
  0x84   :  { %2410 = vperm.xlu0 %2357, %v2409_v49   ;;  %v840_v27 = vmul.f32 %v839_v24, %v834_v4  ;;  %v841_v37 = vmul.f32 %v839_v24, %v2931_v2  ;;  %v353_v49 = vld [vmem:[#allocation2 + $0x48] sm:$0xff]  ;;  %v436_v2 = vld [vmem:[#allocation2 + $0x60] sm:$0xff]  ;;  %v532_v54 = vmax.f32 %v2977_v1, 0.0 }
  0x85   :  { %v356_v4 = vadd.f32 %v353_v49, %v2953_v40 }
  0x87   :  { %2415 = vperm.xlu1 %2368, %v2414_v55   ;;  %v188_v55 = vld [vmem:[#allocation2 + $0x20] sm:$0xff] }
  0x88   :  { %744 = vperm.xlu0 %2357, %v735_v32   ;;  %v842_v32 = vmul.f32 %v839_v24, %v838_v7  ;;  %v2966_v7 = vadd.f32 %v277_v0, %v273_v53  ;;  %v191_v14 = vadd.f32 %v188_v55, %v2958_v42  ;;  %v610_v55 = vld [vmem:[#allocation6 + $0x98] sm:$0xff] }
  0x8a   :  { %v283_v24 = vmax.f32 %v2966_v7, 0.0 }
  0x8b   :  { %785 = vperm.xlu1 %2368, %v2531_v5   ;;  %v357_v5 = vadd.f32 %v354_v50, %v2958_v42 }
  0x8c   :  { %2420 = vperm.xlu0 %2357, %v2419_v43   ;;  %v487_v43 = vmul.f32 1e+30, %v484_v12 }
  0x8f   :  { %251 = vperm.xlu1 %2368, %v2910_v34   ;;  %v852_v34 = vmul.f32 %v2537_v30, %v849_v25  ;;  %v197_v25 = vadd.f32 %v194_v6, %v190_v9  ;;  %v117_v30 = vmax.f32 %v114_v13, 0.0 }
  0x90   :  { %168 = vperm.xlu0 %2357, %v155_v57   ;;  %v274_v57 = vadd.f32 %v271_v46, %v2958_v42  ;;  %v693_v46 = vld [vmem:[#allocation6 + $0xb0] sm:$0xff] }
  0x91   :  { %v855_v41 = vmul.f32 %v2078_v31, %v852_v34  ;;  %v2979_v34 = vadd.f32 %v527_v15, %v523_v18  ;;  %v200_v49 = vmax.f32 %v197_v25, 0.0 }
  0x92   :  { %v281_v12 = vadd.f32 %v278_v52, %v274_v57 }
  0x93   :  { %417 = vperm.xlu1 %2368, %v404_v60   ;;  %v861_v44 = vadd.f32 %v858_v36, %v855_v41  ;;  %v109_v60 = vadd.f32 %v106_v48, %v2958_v42  ;;  %v602_v36 = vld [vmem:[#allocation2 + $0x90] sm:$0xff] }
  0x94   :  { %334 = vperm.xlu0 %2357, %v321_v61   ;;  %v360_v61 = vld [vmem:[#allocation6 + $0x48] sm:$0xff]  ;;  %v284_v28 = vmax.f32 %v281_v12, 0.0  ;;  %v605_v56 = vadd.f32 %v602_v36, %v2953_v40 }
  0x95   :  { %v115_v16 = vadd.f32 %v112_v58, %v109_v60  ;;  %v2972_v20 = vadd.f32 %v360_v61, %v356_v4  ;;  %v533_v58 = vmax.f32 %v2979_v34, 0.0  ;;  %v696_v60 = vadd.f32 %v693_v46, %v689_v35 }
  0x97   :  { %583 = vperm.xlu1 %2368, %v570_v62   ;;  %v361_v62 = vld [vmem:[#allocation6 + $0x50] sm:$0xff]  ;;  %v118_v33 = vmax.f32 %v115_v16, 0.0  ;;  %v366_v41 = vmax.f32 %v2972_v20, 0.0  ;;  %v699_v19 = vmax.f32 %v696_v60, 0.0 }
  0x98   :  { %500 = vperm.xlu0 %2357, %v487_v43   ;;  %v685_v43 = vld [vmem:[#allocation2 + $0xa8] sm:$0xff] }
  0x9b   :  { %749 = vperm.xlu1 %2368, %v736_v22   ;;  %v364_v22 = vadd.f32 %v361_v62, %v357_v5 }
  0x9c   :  { %666 = vperm.xlu0 %2357, %v653_v21   ;;  %v439_v21 = vadd.f32 %v436_v2, %v2953_v40  ;;  %v609_v2 = vld [vmem:[#allocation6 + $0x90] sm:$0xff] }
  0x9d   :  { %v612_v17 = vadd.f32 %v609_v2, %v605_v56 }
  0x9f   :  { %864 = vperm.xlu1 %2368, %v840_v27   ;;  %v440_v27 = vadd.f32 %v437_v11, %v2958_v42 }
  0xa0   :  { %824 = vperm.xlu0 %2357, %v2078_v31   ;;  %v198_v31 = vadd.f32 %v195_v8, %v191_v14 }
  0xa1   :  { %v447_v50 = vadd.f32 %v444_v23, %v440_v27 }
  0xa2   :  { %v201_v53 = vmax.f32 %v198_v31, 0.0 }
  0xa3   :  { %874 = vperm.xlu1 %2368, %v842_v32   ;;  %v603_v32 = vld [vmem:[#allocation2 + $0x98] sm:$0xff]  ;;  %v450_v7 = vmax.f32 %v447_v50, 0.0 }
  0xa4   :  { %869 = vperm.xlu0 %2357, %v841_v37   ;;  %v688_v37 = vadd.f32 %v685_v43, %v2953_v40  ;;  %v606_v0 = vadd.f32 %v603_v32, %v2958_v42 }
  0xa6   :  { %v2990_v59 = vadd.f32 %v692_v45, %v688_v37  ;;  %v613_v8 = vadd.f32 %v610_v55, %v606_v0 }
  0xa7   :  { %896 = vperm.xlu1 %2368, %v860_v38  }
  0xa8   :  { %891 = vperm.xlu0 %2357, %v859_v3   ;;  %v367_v3 = vmax.f32 %v364_v22, 0.0  ;;  %v698_v15 = vmax.f32 %v2990_v59, 0.0 }
  0xac   :  { %901 = vperm.xlu0 %2357, %v861_v44   ;;  %v2984_v44 = vadd.f32 %v443_v26, %v439_v21 }
  0xae   :  { %v449_v42 = vmax.f32 %v2984_v44, 0.0 }
  0xcc   :  { %v2371_v39 = vpop.permute.xlu1 %2370  ;;  %v2360_v29 = vpop.permute.xlu0 %2359 }
  0xcd   :  { %v2362_v38 = vunpack.i.h.bf16 %v2360_v29  ;;  %v2373_v47 = vunpack.i.h.bf16 %v2371_v39  ;;  %v2361_v51 = vunpack.i.l.bf16 %v2360_v29  ;;  %v2372_v4 = vunpack.i.l.bf16 %v2371_v39 }
  0xce   :  { %v616_v39 = vmax.f32 %v613_v8, 0.0 }
  0xcf   :  { %v2992_v61 = vmul.f32 %v2362_v38, %v118_v33  ;;  %v2995_v5 = vmul.f32 %v2373_v47, %v284_v28  ;;  %v2997_v40 = vmul.f32 %v2361_v51, %v117_v30  ;;  %v3012_v20 = vmul.f32 %v2372_v4, %v283_v24 }
  0xd0   :  { %v2376_v48 = vpop.permute.xlu1 %2375  ;;  %v2365_v52 = vpop.permute.xlu0 %2364 }
  0xd1   :  { %v2378_v57 = vunpack.i.h.bf16 %v2376_v48  ;;  %v2367_v62 = vunpack.i.h.bf16 %v2365_v52  ;;  %v2366_v63 = vunpack.i.l.bf16 %v2365_v52  ;;  %v2377_v9 = vunpack.i.l.bf16 %v2376_v48 }
  0xd2   :  { %v142_v16 = vmul.f32 %v2992_v61, %v2992_v61  ;;  %v308_v25 = vmul.f32 %v2995_v5, %v2995_v5  ;;  %v141_v26 = vmul.f32 %v2997_v40, %v2997_v40  ;;  %v148_v8 = vmax.f32 %v2992_v61, 0.0 }
  0xd3   :  { %v2999_v10 = vmul.f32 %v2366_v63, %v200_v49  ;;  %v3001_v11 = vmul.f32 %v2367_v62, %v201_v53  ;;  %v3003_v13 = vmul.f32 %v2378_v57, %v367_v3  ;;  %v3020_v27 = vmul.f32 %v2377_v9, %v366_v41 }
  0xd4   :  { %v2386_v6 = vpop.permute.xlu1 %2385  ;;  %v2381_v12 = vpop.permute.xlu0 %2380  ;;  %v615_v41 = vmax.f32 %v612_v17, 0.0  ;;  %v307_v3 = vmul.f32 %v3012_v20, %v3012_v20  ;;  %v147_v62 = vmax.f32 %v2997_v40, 0.0 }
  0xd5   :  { %v2383_v14 = vunpack.i.h.bf16 %v2381_v12  ;;  %v222_v18 = vadd.f32 %v3001_v11, %v2992_v61  ;;  %v225_v43 = vmul.f32 %v3001_v11, %v3001_v11  ;;  %v224_v22 = vmul.f32 %v2999_v10, %v2999_v10 }
  0xd6   :  { %v2388_v21 = vunpack.i.h.bf16 %v2386_v6  ;;  %v391_v24 = vmul.f32 %v3003_v13, %v3003_v13  ;;  %v2387_v31 = vunpack.i.l.bf16 %v2386_v6  ;;  %v2382_v1 = vunpack.i.l.bf16 %v2381_v12 }
  0xd7   :  { %v228_v28 = vadd.f32 %v225_v43, %v142_v16  ;;  %v3024_v23 = vmul.f32 %v2383_v14, %v450_v7  ;;  %v221_v32 = vadd.f32 %v2999_v10, %v2997_v40  ;;  %v305_v34 = vadd.f32 %v2995_v5, %v222_v18 }
  0xd8   :  { %v2396_v29 = vpop.permute.xlu1 %2395  ;;  %v2391_v30 = vpop.permute.xlu0 %2390  ;;  %v227_v35 = vadd.f32 %v224_v22, %v141_v26  ;;  %v3029_v36 = vmul.f32 %v2388_v21, %v533_v58  ;;  %v390_v47 = vmul.f32 %v3020_v27, %v3020_v27  ;;  %v3036_v48 = vmul.f32 %v2382_v1, %v449_v42 }
  0xd9   :  { %v2393_v33 = vunpack.i.h.bf16 %v2391_v30  ;;  %v311_v37 = vadd.f32 %v308_v25, %v228_v28  ;;  %v2398_v38 = vunpack.i.h.bf16 %v2396_v29  ;;  %v2392_v44 = vunpack.i.l.bf16 %v2391_v30 }
  0xda   :  { %v388_v45 = vadd.f32 %v3003_v13, %v305_v34  ;;  %v474_v50 = vmul.f32 %v3024_v23, %v3024_v23  ;;  %v3042_v0 = vmul.f32 %v2387_v31, %v532_v54  ;;  %v2397_v51 = vunpack.i.l.bf16 %v2396_v29 }
  0xdb   :  { %v394_v46 = vadd.f32 %v391_v24, %v311_v37  ;;  %v3038_v49 = vmul.f32 %v2393_v33, %v616_v39  ;;  %v304_v55 = vadd.f32 %v3012_v20, %v221_v32  ;;  %v3046_v56 = vmul.f32 %v2398_v38, %v699_v19 }
  0xdc   :  { %v471_v53 = vadd.f32 %v3024_v23, %v388_v45  ;;  %v557_v58 = vmul.f32 %v3029_v36, %v3029_v36  ;;  %v310_v60 = vadd.f32 %v307_v3, %v227_v35  ;;  %v3051_v63 = vmul.f32 %v2392_v44, %v615_v41 }
  0xdd   :  { %v477_v57 = vadd.f32 %v474_v50, %v394_v46  ;;  %v387_v42 = vadd.f32 %v3020_v27, %v304_v55  ;;  %v640_v4 = vmul.f32 %v3038_v49, %v3038_v49  ;;  %v473_v7 = vmul.f32 %v3036_v48, %v3036_v48  ;;  %v3099_v50 = vld [vmem:[%s3352_s0 + $0x10] sm:$0xff] }
  0xde   :  { %v781_v52 = vpop.permute.xlu1 %780  ;;  %v554_v54 = vadd.f32 %v3029_v36, %v471_v53  ;;  %v393_v6 = vadd.f32 %v390_v47, %v310_v60  ;;  %v3060_v9 = vmul.f32 %v2397_v51, %v698_v15  ;;  %v723_v18 = vmul.f32 %v3046_v56, %v3046_v56  ;;  %v107_v47 = vld [vmem:[#allocation2 + $0x10] sm:$0xff]  ;;  %v189_v53 = vld [vmem:[#allocation2 + $0x28] sm:$0xff] }
  0xdf   :  { %v776_v59 = vpop.permute.xlu0 %775  ;;  %v560_v2 = vadd.f32 %v557_v58, %v477_v57  ;;  %v470_v14 = vadd.f32 %v3036_v48, %v387_v42  ;;  %v556_v19 = vmul.f32 %v3042_v0, %v3042_v0  ;;  %v230_v21 = vmax.f32 %v147_v62, %v2999_v10 }
  0xe0   :  { %v637_v12 = vadd.f32 %v3038_v49, %v554_v54  ;;  %v476_v43 = vadd.f32 %v473_v7, %v393_v6  ;;  %v231_v25 = vmax.f32 %v148_v8, %v3001_v11  ;;  %v639_v29 = vmul.f32 %v3051_v63, %v3051_v63  ;;  %v272_v54 = vld [vmem:[#allocation2 + $0x40] sm:$0xff]  ;;  %v355_v7 = vld [vmem:[#allocation2 + $0x58] sm:$0xff] }
  0xe1   :  { %v643_v16 = vadd.f32 %v640_v4, %v560_v2  ;;  %v553_v39 = vadd.f32 %v3042_v0, %v470_v14  ;;  %v722_v33 = vmul.f32 %v3060_v9, %v3060_v9  ;;  %v313_v37 = vmax.f32 %v230_v21, %v3012_v20  ;;  %v438_v14 = vld [vmem:[#allocation2 + $0x70] sm:$0xff] }
  0xe2   :  { %v3064_v17 = vpop.permute.xlu1 %163  ;;  %v720_v15 = vadd.f32 %v3046_v56, %v637_v12  ;;  %v559_v28 = vadd.f32 %v556_v19, %v476_v43  ;;  %v314_v41 = vmax.f32 %v231_v25, %v2995_v5  ;;  %v110_v62 = vadd.f32 %v107_v47, %v3099_v50  ;;  %v196_v12 = vld [vmem:[#allocation6 + $0x28] sm:$0xff] }
  0xe3   :  { %v3070_v22 = vpop.permute.xlu0 %158  ;;  %v726_v26 = vadd.f32 %v723_v18, %v643_v16  ;;  %v636_v24 = vadd.f32 %v3051_v63, %v553_v39  ;;  %v396_v55 = vmax.f32 %v313_v37, %v3020_v27  ;;  %v192_v6 = vadd.f32 %v189_v53, %v3099_v50  ;;  %v521_v19 = vld [vmem:[#allocation2 + $0x88] sm:$0xff]  ;;  %v279_v39 = vld [vmem:[#allocation6 + $0x40] sm:$0xff] }
  0xe4   :  { %v3078_v30 = vmul.f32 %v781_v52, %v720_v15  ;;  %v642_v32 = vadd.f32 %v639_v29, %v559_v28  ;;  %v397_v60 = vmax.f32 %v314_v41, %v3003_v13  ;;  %v275_v43 = vadd.f32 %v272_v54, %v3099_v50  ;;  %v528_v41 = vld [vmem:[#allocation6 + $0x88] sm:$0xff] }
  0xe5   :  { %v792_v1 = vmul.f32 %v781_v52, %v726_v26  ;;  %v719_v38 = vadd.f32 %v3060_v9, %v636_v24  ;;  %v479_v16 = vmax.f32 %v396_v55, %v3036_v48  ;;  %v358_v25 = vadd.f32 %v355_v7, %v3099_v50  ;;  %v362_v24 = vld [vmem:[#allocation6 + $0x58] sm:$0xff] }
  0xe6   :  { %v3081_v31 = vpop.permute.xlu1 %246  ;;  %v795_v35 = vmul.f32 %v3078_v30, %v3078_v30  ;;  %v725_v3 = vadd.f32 %v722_v33, %v642_v32  ;;  %v480_v21 = vmax.f32 %v397_v60, %v3024_v23  ;;  %v199_v29 = vadd.f32 %v196_v12, %v192_v6  ;;  %v445_v33 = vld [vmem:[#allocation6 + $0x70] sm:$0xff] }
  0xe7   :  { %v3085_v34 = vpop.permute.xlu0 %241  ;;  %v3092_v45 = vmul.f32 %v776_v59, %v719_v38  ;;  %v524_v37 = vadd.f32 %v521_v19, %v3099_v50  ;;  %v562_v38 = vmax.f32 %v479_v16, %v3042_v0  ;;  %v365_v47 = vadd.f32 %v362_v24, %v358_v25  ;;  %v687_v16 = vld [vmem:[#allocation2 + $0xb8] sm:$0xff] }
  0xe8   :  { %v798_v44 = vsub.f32 %v792_v1, %v795_v35  ;;  %v791_v51 = vmul.f32 %v776_v59, %v725_v3  ;;  %v113_v59 = vld [vmem:[#allocation6 + $0x10] sm:$0xff]  ;;  %v441_v1 = vadd.f32 %v438_v14, %v3099_v50  ;;  %v282_v35 = vadd.f32 %v279_v39, %v275_v43  ;;  %v604_v3 = vld [vmem:[#allocation2 + $0xa0] sm:$0xff] }
  0xe9   :  { %v794_v58 = vmul.f32 %v3092_v45, %v3092_v45  ;;  %v116_v15 = vadd.f32 %v113_v59, %v110_v62  ;;  %v3128_v54 = vadd.f32 %v528_v41, %v524_v37  ;;  %v172_v59 = vadd.f32 %v3064_v17, %v2992_v61  ;;  %v611_v14 = vld [vmem:[#allocation6 + $0xa0] sm:$0xff] }
  0xea   :  { %v3094_v46 = vpop.permute.xlu1 %329  ;;  %v801_v57 = vmax.f32 %v798_v44, 0.0  ;;  %v3126_v60 = vadd.f32 %v445_v33, %v441_v1  ;;  %v285_v7 = vmax.f32 %v282_v35, 0.0  ;;  %v645_v12 = vmax.f32 %v562_v38, %v3051_v63 }
  0xeb   :  { %v3101_v52 = vpop.permute.xlu0 %324  ;;  %v797_v2 = vsub.f32 %v791_v51, %v794_v58  ;;  %v119_v44 = vmax.f32 %v116_v15, 0.0  ;;  %v563_v51 = vmax.f32 %v480_v21, %v3029_v36  ;;  %v368_v43 = vmax.f32 %v365_v47, 0.0 }
  0xec   :  { %v3108_v42 = vadd.f32 1e-05, %v801_v57  ;;  %v202_v57 = vmax.f32 %v199_v29, 0.0  ;;  %v255_v15 = vadd.f32 %v3081_v31, %v3001_v11  ;;  %v451_v17 = vmax.f32 %v3126_v60, 0.0 }
  0xed   :  { %v800_v18 = vmax.f32 %v797_v2, 0.0  ;;  %v607_v2 = vadd.f32 %v604_v3, %v3099_v50  ;;  %v646_v19 = vmax.f32 %v563_v51, %v3038_v49  ;;  %v254_v29 = vadd.f32 %v3085_v34, %v2999_v10 }
  0xee   :  { %v3110_v4 = vpop.permute.xlu1 %412  ;;  %2538 = vrsqrt.f32 %v3108_v42  ;;  %v690_v1 = vadd.f32 %v687_v16, %v3099_v50  ;;  %v338_v11 = vadd.f32 %v3094_v46, %v2995_v5  ;;  %v3155_v33 = vmax.f32 %v645_v12, %v3060_v9  ;;  %v2462_v12 = vld [vmem:[#allocation9 + $0x1c8] sm:$0xff]  }
  0xef   :  { %v3113_v8 = vpop.permute.xlu0 %407  ;;  %v803_v26 = vadd.f32 1e-05, %v800_v18  ;;  %v171_v18 = vadd.f32 %v3070_v22, %v2997_v40  ;;  %v534_v40 = vmax.f32 %v3128_v54, 0.0  ;;  %v3147_v22 = vadd.f32 %v611_v14, %v607_v2 }
  0xf0   :  { %v337_v10 = vadd.f32 %v3101_v52, %v3012_v20  ;;  %v3163_v35 = vmax.f32 %v646_v19, %v3046_v56  ;;  %v421_v20 = vadd.f32 %v3110_v4, %v3003_v13  ;;  %v420_v52 = vadd.f32 %v3113_v8, %v3020_v27  ;;  %v694_v4 = vld [vmem:[#allocation6 + $0xb8] sm:$0xff]  ;;  %v2459_v8 = vld [vmem:[#allocation9 + $0x180] sm:$0xff]  }
  0xf1   :  { %2540 = vrsqrt.f32 %v803_v26  ;;  %v174_v37 = vmin.f32 %v171_v18, 1e+30 }
  0xf2   :  { %v3120_v28 = vpop.permute.xlu1 %490 }
  0xf3   :  { %v2401_v32 = vpop.permute.xlu0 %2400  ;;  %v257_v47 = vmin.f32 %v174_v37, %v254_v29  ;;  %v503_v54 = vadd.f32 %v3120_v28, %v3036_v48 }
  0xf4   :  { %v2403_v53 = vunpack.i.h.bf16 %v2401_v32  ;;  %v2402_v55 = vunpack.i.l.bf16 %v2401_v32  ;;  %v175_v32 = vmin.f32 %v172_v59, 1e+30 }
  0xf5   :  { %v340_v60 = vmin.f32 %v257_v47, %v337_v10 }
  0xf6   :  { %v2406_v58 = vpop.permute.xlu1 %2405  ;;  %v3139_v39 = vmul.f32 %v2402_v55, %v119_v44  ;;  %v3141_v25 = vmul.f32 %v2403_v53, %v202_v57  ;;  %v258_v41 = vmin.f32 %v175_v32, %v255_v15  ;;  %v2463_v32 = vld [vmem:[#allocation9 + $0x188] sm:$0xff]  }
  0xf7   :  { %v496_v62 = vpop.permute.xlu0 %495  ;;  %v2407_v6 = vunpack.i.l.bf16 %v2406_v58  ;;  %v2408_v3 = vunpack.i.h.bf16 %v2406_v58  ;;  %v617_v58 = vmax.f32 %v3147_v22, 0.0  ;;  %v423_v16 = vmin.f32 %v340_v60, %v420_v52 }
  0xf8   :  { %v2539_v21 = vpop.eup %2538  ;;  %v143_v5 = vmul.f32 %v3139_v39, %v3139_v39  ;;  %v226_v46 = vmul.f32 %v3141_v25, %v3141_v25  ;;  %v341_v53 = vmin.f32 %v258_v41, %v338_v11  ;;  %v223_v55 = vadd.f32 %v3141_v25, %v3139_v39 }
  0xf9   :  { %v3152_v31 = vmul.f32 %v2407_v6, %v285_v7  ;;  %v3160_v34 = vmul.f32 %v2539_v21, %v3108_v42  ;;  %v504_v13 = vadd.f32 %v496_v62, %v3024_v23  ;;  %v3186_v59 = vmul.f32 %v2408_v3, %v368_v43 }
  0xfa   :  { %v579_v61 = vpop.permute.xlu1 %578  ;;  %v920_v6 = vpack.c.bf16 %v3163_v35, %v3155_v33  ;;  %v424_v14 = vmin.f32 %v341_v53, %v421_v20  ;;  %v697_v21 = vadd.f32 %v694_v4, %v690_v1  ;;  %v506_v43 = vmin.f32 %v423_v16, %v503_v54  ;;  %v2466_v1 = vld [vmem:[#allocation9 + $0x1d0] sm:$0xff]  }
  0xfb   :  { %v574_v24 = vpop.permute.xlu0 %573  ;;  %v2541_v38 = vpop.eup %2540  ;;  %v309_v57 = vmul.f32 %v3152_v31, %v3152_v31  ;;  %v306_v2 = vadd.f32 %v3152_v31, %v223_v55  ;;  %v587_v48 = vadd.f32 %v579_v61, %v3029_v36  ;;  %v392_v36 = vmul.f32 %v3186_v59, %v3186_v59  ;;  %v2467_v20 = vld [vmem:[#allocation9 + $0x190] sm:$0xff]  }
  0xfc   :  { %v3173_v51 = vmul.f32 %v2541_v38, %v803_v26  ;;  %v229_v26 = vadd.f32 %v226_v46, %v143_v5  ;;  %v586_v23 = vadd.f32 %v574_v24, %v3042_v0  ;;  %v507_v15 = vmin.f32 %v424_v14, %v504_v13  ;;  %v2474_v14 = vld [vmem:[#allocation9 + $0x1e0] sm:$0xff]  }
  0xfd   :  { %v389_v11 = vadd.f32 %v3186_v59, %v306_v2  ;;  %v700_v3 = vmax.f32 %v697_v21, 0.0  ;;  %v149_v16 = vmax.f32 %v3139_v39, 0.0  ;;  %v2458_v21 = vld [vmem:[#allocation9 + $0x100] sm:$0xff]  }
  0xfe   :  { %v662_v44 = vpop.permute.xlu1 %661  ;;  %v922_v27 = vpack.c.bf16 %v3160_v34, %v3173_v51  ;;  %v312_v62 = vadd.f32 %v309_v57, %v229_v26  ;;  %v590_v37 = vmin.f32 %v507_v15, %v587_v48  ;;  %v589_v10 = vmin.f32 %v506_v43, %v586_v23  ;;  %v2470_v57 = vld [vmem:[#allocation9 + $0x1d8] sm:$0xff]   ;;  %v2460_v15 = vld [vmem:[#allocation9 + $0x148] sm:$0xff]  }
  0xff   :  { %v657_v42 = vpop.permute.xlu0 %656  ;;  %v670_v29 = vadd.f32 %v662_v44, %v3038_v49  ;;  %v916_v43 = vpack.c.bf16 %v3078_v30, %v3092_v45 }
 0x100   :  { %1795 = vmatprep.mubr.bf16.mxu1 %v922_v27  ;;  %v669_v22 = vadd.f32 %v657_v42, %v3051_v63  ;;  %v395_v41 = vadd.f32 %v392_v36, %v312_v62 }
 0x101   :  { %1796 = vmatmul.mubr.bf16.vlgmr.msra.gmra.mrb[0].mxu1 %v920_v6 }
 0x102   :  { %v740_v7 = vpop.permute.xlu1 %739  ;;  %2263 = vmatpush3.bf16.msra.mxu1 %v2459_v8  ;;  %v672_v44 = vmin.f32 %v589_v10, %v669_v22  ;;  %v2471_v8 = vld [vmem:[#allocation9 + $0x198] sm:$0xff]  }
 0x103   :  { %v2411_v28 = vpop.permute.xlu0 %2410  ;;  %2264 = vmatprep.subr.bf16.mxu1 %v2462_v12  ;;  %v752_v49 = vadd.f32 %v740_v7, %v3060_v9 }
 0x104   :  { %v2413_v18 = vunpack.i.h.bf16 %v2411_v28  ;;  %v2412_v19 = vunpack.i.l.bf16 %v2411_v28 }
 0x105   :  { %v755_v60 = vmin.f32 %v672_v44, %v752_v49 }
 0x106   :  { %v3197_v0 = vmul.f32 %v2412_v19, %v451_v17  ;;  %v3199_v61 = vmul.f32 %v2413_v18, %v534_v40  ;;  %v2416_v24 = vpop.permute.xlu1 %2415  ;;  %v673_v17 = vmin.f32 %v590_v37, %v670_v29  ;;  %2265 = vmatpush3.bf16.msra.mxu1 %v2463_v32  ;;  %v2475_v29 = vld [vmem:[#allocation9 + $0x1a0] sm:$0xff]   ;;  %v232_v37 = vmax.f32 %v149_v16, %v3141_v25  ;;  %v2487_v16 = vld [vmem:[#allocation9 + $0x1b8] sm:$0xff]  }
 0x107   :  { %v2417_v38 = vunpack.i.l.bf16 %v2416_v24  ;;  %v745_v63 = vpop.permute.xlu0 %744  ;;  %v2418_v53 = vunpack.i.h.bf16 %v2416_v24  ;;  %2266 = vmatprep.subr.bf16.mxu1 %v2466_v1 }
 0x108   :  { %v472_v5 = vadd.f32 %v3197_v0, %v389_v11  ;;  %v475_v46 = vmul.f32 %v3197_v0, %v3197_v0  ;;  %v753_v47 = vadd.f32 %v745_v63, %v3046_v56  ;;  %v558_v42 = vmul.f32 %v3199_v61, %v3199_v61 }
 0x109   :  { %v3205_v40 = vmul.f32 %v2417_v38, %v617_v58  ;;  %v3214_v2 = vmul.f32 %v2418_v53, %v755_v60  ;;  %v2461_v38 = vld [vmem:[#allocation9 + $0x108] sm:$0xff]   ;;  %v2465_v53 = vld [vmem:[#allocation9 + $0x110] sm:$0xff]  }
 0x10a   :  { %v478_v52 = vadd.f32 %v475_v46, %v395_v41  ;;  %v555_v9 = vadd.f32 %v3199_v61, %v472_v5  ;;  %v786_v55 = vpop.permute.xlu1 %785  ;;  %v756_v27 = vmin.f32 %v673_v17, %v753_v47  ;;  %2267 = vmatpush3.bf16.msra.mxu1 %v2467_v20  ;;  %v2464_v41 = vld [vmem:[#allocation9 + $0x150] sm:$0xff]   ;;  %v2479_v5 = vld [vmem:[#allocation9 + $0x1a8] sm:$0xff]  }
 0x10b   :  { %v641_v54 = vmul.f32 %v3205_v40, %v3205_v40  ;;  %v2421_v58 = vpop.permute.xlu0 %2420  ;;  %2268 = vmatprep.subr.bf16.mxu1 %v2470_v57  ;;  %v2482_v47 = vld [vmem:[#allocation9 + $0x1f0] sm:$0xff]  }
 0x10c   :  { %v561_v13 = vadd.f32 %v558_v42, %v478_v52  ;;  %v2423_v56 = vunpack.i.h.bf16 %v2421_v58  ;;  %v2422_v4 = vunpack.i.l.bf16 %v2421_v58  ;;  %v638_v26 = vadd.f32 %v3205_v40, %v555_v9  ;;  %v2483_v60 = vld [vmem:[#allocation9 + $0x1b0] sm:$0xff]  }
 0x10d   :  { %v315_v52 = vmax.f32 %v232_v37, %v3152_v31 }
 0x10e   :  { %v3216_v6 = vmul.f32 %v2423_v56, %v700_v3  ;;  %v3218_v7 = vmul.f32 %v2422_v4, %v756_v27  ;;  %v252_v12 = vpop.permute.xlu1 %251  ;;  %v644_v48 = vadd.f32 %v641_v54, %v561_v13  ;;  %2269 = vmatpush3.bf16.msra.mxu1 %v2471_v8  ;;  %v2486_v27 = vld [vmem:[#allocation9 + $0x1f8] sm:$0xff]  }
 0x10f   :  { %v169_v23 = vpop.permute.xlu0 %168  ;;  %v256_v32 = vadd.f32 %v252_v12, %v3141_v25  ;;  %2270 = vmatprep.subr.bf16.mxu1 %v2474_v14  ;;  %v2469_v12 = vld [vmem:[#allocation9 + $0x118] sm:$0xff]   ;;  %v2472_v14 = vld [vmem:[#allocation9 + $0x160] sm:$0xff]  }
 0x110   :  { %v721_v28 = vadd.f32 %v3216_v6, %v638_v26  ;;  %v724_v62 = vmul.f32 %v3216_v6, %v3216_v6  ;;  %v173_v18 = vadd.f32 %v169_v23, %v3139_v39  ;;  %v918_v19 = vpack.c.bf16 %v3218_v7, %v3214_v2  ;;  %v2478_v39 = vld [vmem:[#allocation9 + $0x1e8] sm:$0xff]  }
 0x112   :  { %v727_v22 = vadd.f32 %v724_v62, %v644_v48  ;;  %v176_v11 = vmin.f32 %v173_v18, 1e+30  ;;  %1747 = vmatprep.mubr.bf16.mxu0 %v918_v19  ;;  %v418_v36 = vpop.permute.xlu1 %417  ;;  %v3230_v24 = vmul.f32 %v786_v55, %v721_v28  ;;  %2271 = vmatpush3.bf16.msra.mxu1 %v2475_v29  ;;  %v2490_v18 = vld [vmem:[#allocation9 + $0x2c0] sm:$0xff]  }
 0x113   :  { %v335_v1 = vpop.permute.xlu0 %334  ;;  %1748 = vmatmul.mubr.bf16.vlgmr.msra.gmra.mrb[0].mxu0 %v916_v43  ;;  %v422_v3 = vadd.f32 %v418_v36, %v3186_v59  ;;  %2272 = vmatprep.subr.bf16.mxu1 %v2478_v39  ;;  %v2476_v43 = vld [vmem:[#allocation9 + $0x168] sm:$0xff]  }
 0x114   :  { %v259_v10 = vmin.f32 %v176_v11, %v256_v32  ;;  %v339_v49 = vadd.f32 %v335_v1, %v3152_v31  ;;  %2235 = vmatpush3.bf16.msra.mxu0 %v2458_v21  ;;  %v793_v63 = vmul.f32 %v786_v55, %v727_v22  ;;  %v796_v46 = vmul.f32 %v3230_v24, %v3230_v24  ;;  %v2468_v55 = vld [vmem:[#allocation9 + $0x158] sm:$0xff]   ;;  %v2473_v21 = vld [vmem:[#allocation9 + $0x120] sm:$0xff]   ;;  %v2477_v1 = vld [vmem:[#allocation9 + $0x128] sm:$0xff]  }
 0x115   :  { %2236 = vmatprep.subr.bf16.mxu0 %v2460_v15  ;;  %v398_v31 = vmax.f32 %v315_v52, %v3186_v59 }
 0x116   :  { %v342_v17 = vmin.f32 %v259_v10, %v339_v49  ;;  %v584_v44 = vpop.permute.xlu1 %583  ;;  %v799_v20 = vsub.f32 %v793_v63, %v796_v46  ;;  %2273 = vmatpush3.bf16.msra.mxu1 %v2479_v5  ;;  %v917_v49 = vpack.c.bf16 %v3230_v24, %v3230_v24  ;;  %v2480_v63 = vld [vmem:[#allocation9 + $0x170] sm:$0xff]  }
 0x117   :  { %v501_v25 = vpop.permute.xlu0 %500  ;;  %v588_v54 = vadd.f32 %v584_v44, %v3199_v61  ;;  %2274 = vmatprep.subr.bf16.mxu1 %v2482_v47  ;;  %v481_v48 = vmax.f32 %v398_v31, %v3197_v0 }
 0x118   :  { %v425_v9 = vmin.f32 %v342_v17, %v422_v3  ;;  %v505_v42 = vadd.f32 %v501_v25, %v3197_v0  ;;  %2237 = vmatpush3.bf16.msra.mxu0 %v2461_v38  ;;  %v802_v57 = vmax.f32 %v799_v20, 0.0  ;;  %v2481_v20 = vld [vmem:[#allocation9 + $0x130] sm:$0xff]  }
 0x119   :  { %2238 = vmatprep.subr.bf16.mxu0 %v2464_v41  ;;  %v564_v15 = vmax.f32 %v481_v48, %v3199_v61  ;;  %v2496_v48 = vld [vmem:[#allocation9 + $0x250] sm:$0xff]  }
 0x11a   :  { %v508_v58 = vmin.f32 %v425_v9, %v505_v42  ;;  %v750_v13 = vpop.permute.xlu1 %749  ;;  %v805_v4 = vadd.f32 1e-05, %v802_v57  ;;  %2275 = vmatpush3.bf16.msra.mxu1 %v2483_v60  ;;  %v2484_v9 = vld [vmem:[#allocation9 + $0x178] sm:$0xff]   ;;  %v2488_v60 = vld [vmem:[#allocation9 + $0x240] sm:$0xff]  }
 0x11b   :  { %v667_v56 = vpop.permute.xlu0 %666  ;;  %v754_v23 = vadd.f32 %v750_v13, %v3216_v6  ;;  %2276 = vmatprep.subr.bf16.mxu1 %v2486_v27  ;;  %v647_v41 = vmax.f32 %v564_v15, %v3205_v40  ;;  %v2485_v57 = vld [vmem:[#allocation9 + $0x138] sm:$0xff]   ;;  %v2489_v13 = vld [vmem:[#allocation9 + $0x200] sm:$0xff]   ;;  %v2499_v15 = vld [vmem:[#allocation9 + $0x290] sm:$0xff]  }
 0x11c   :  { %v591_v8 = vmin.f32 %v508_v58, %v588_v54  ;;  %v671_v26 = vadd.f32 %v667_v56, %v3205_v40  ;;  %2239 = vmatpush3.bf16.msra.mxu0 %v2465_v53  ;;  %2542 = vrsqrt.f32 %v805_v4 }
 0x11d   :  { %2240 = vmatprep.subr.bf16.mxu0 %v2468_v55  ;;  %v3279_v40 = vmax.f32 %v647_v41, %v3216_v6  ;;  %v2513_v41 = vld [vmem:[#allocation9 + $0x230] sm:$0xff]  }
 0x11e   :  { %v674_v28 = vmin.f32 %v591_v8, %v671_v26  ;;  %v3244_v62 = vpop.permute.xlu1 %864  ;;  %2277 = vmatpush3.bf16.msra.mxu1 %v2487_v16  ;;  %v2491_v8 = vld [vmem:[#allocation9 + $0x280] sm:$0xff]   ;;  %v2493_v16 = vld [vmem:[#allocation9 + $0x208] sm:$0xff]  }
 0x11f   :  { %v825_v59 = vpop.permute.xlu0 %824  ;;  %2318 = vmatprep.subr.bf16.mxu1 %v2490_v18  ;;  %v877_v32 = vmul.f32 %v3244_v62, %v3092_v45  ;;  %v880_v11 = vmul.f32 %v3244_v62, %v3214_v2  ;;  %v886_v42 = vmul.f32 %v3244_v62, %v3173_v51  ;;  %v921_v53 = vpack.c.bf16 %v3279_v40, %v3279_v40 }
 0x120   :  { %v757_v19 = vmin.f32 %v674_v28, %v754_v23  ;;  %2241 = vmatpush3.bf16.msra.mxu0 %v2469_v12  ;;  %v883_v56 = vmul.f32 %v3244_v62, %v3155_v33  ;;  %v2494_v12 = vld [vmem:[#allocation9 + $0x2c8] sm:$0xff]   ;;  %v2498_v62 = vld [vmem:[#allocation9 + $0x2d0] sm:$0xff]  }
 0x121   :  { %2242 = vmatprep.subr.bf16.mxu0 %v2472_v14  ;;  %v2495_v28 = vld [vmem:[#allocation9 + $0x288] sm:$0xff]  }
 0x122   :  { %v3247_v29 = vmul.f32 %v825_v59, %v757_v19  ;;  %v3249_v22 = vpop.permute.xlu1 %874 }
 0x123   :  { %v870_v0 = vpop.permute.xlu0 %869  ;;  %v885_v18 = vmul.f32 %v3249_v22, %v3279_v40 }
 0x124   :  { %v878_v36 = vmul.f32 %v870_v0, %v3078_v30  ;;  %v881_v39 = vmul.f32 %v870_v0, %v3218_v7  ;;  %2243 = vmatpush3.bf16.msra.mxu0 %v2473_v21  ;;  %v919_v61 = vpack.c.bf16 %v3247_v29, %v3247_v29  ;;  %v887_v25 = vmul.f32 %v870_v0, %v3160_v34  ;;  %v2497_v21 = vld [vmem:[#allocation9 + $0x210] sm:$0xff]  }
 0x125   :  { %2244 = vmatprep.subr.bf16.mxu0 %v2476_v43  ;;  %v882_v54 = vmul.f32 %v3249_v22, %v3247_v29  ;;  %v884_v58 = vmul.f32 %v870_v0, %v3163_v35  ;;  %v929_v0 = vpack.c.bf16 %v885_v18, %v885_v18 }
 0x126   :  { %v924_v37 = vpack.c.bf16 %v878_v36, %v877_v32  ;;  %v3259_v10 = vpop.permute.xlu1 %896  ;;  %v926_v38 = vpack.c.bf16 %v881_v39, %v880_v11  ;;  %v2543_v5 = vpop.eup %2542  ;;  %1755 = vmatprep.mubr.bf16.mxu0 %v919_v61  ;;  %v930_v55 = vpack.c.bf16 %v887_v25, %v886_v42  ;;  %v2502_v32 = vld [vmem:[#allocation9 + $0x2d8] sm:$0xff]   ;;  %v2506_v36 = vld [vmem:[#allocation9 + $0x2e0] sm:$0xff]   ;;  %v2508_v61 = vld [vmem:[#allocation9 + $0x268] sm:$0xff]  }
 0x127   :  { %v3266_v46 = vmul.f32 %v3259_v10, %v3078_v30  ;;  %v3270_v3 = vmul.f32 %v3259_v10, %v3163_v35  ;;  %v892_v17 = vpop.permute.xlu0 %891  ;;  %1756 = vmatmul.mubr.bf16.gmra.mrb[4].mxu0 %v917_v49  ;;  %v3282_v30 = vmul.f32 %v2543_v5, %v805_v4  ;;  %v2492_v4 = vld [vmem:[#allocation9 + $0x248] sm:$0xff]   ;;  %v927_v31 = vpack.c.bf16 %v882_v54, %v882_v54  ;;  %v2501_v11 = vld [vmem:[#allocation9 + $0x218] sm:$0xff]   ;;  %v2505_v39 = vld [vmem:[#allocation9 + $0x220] sm:$0xff]  }
 0x128   :  { %v3273_v44 = vmul.f32 %v892_v17, %v3092_v45  ;;  %v3276_v47 = vmul.f32 %v892_v17, %v3155_v33  ;;  %2245 = vmatpush3.bf16.msra.mxu0 %v2477_v1  ;;  %1843 = vmatprep.mubr.bf16.mxu0 %v926_v38  ;;  %v928_v26 = vpack.c.bf16 %v884_v58, %v883_v56  ;;  %v2507_v1 = vld [vmem:[#allocation9 + $0x2a0] sm:$0xff]   ;;  %v2512_v49 = vld [vmem:[#allocation9 + $0x270] sm:$0xff]   ;;  %v2511_v38 = vld [vmem:[#allocation9 + $0x2a8] sm:$0xff]  }
 0x129   :  { %2246 = vmatprep.subr.bf16.mxu0 %v2480_v63  ;;  %v923_v6 = vpack.c.bf16 %v3282_v30, %v3282_v30  ;;  %v888_v27 = vmul.f32 %v3249_v22, %v3282_v30  ;;  %v879_v35 = vmul.f32 %v3249_v22, %v3230_v24  ;;  %v908_v33 = vmul.f32 %v3259_v10, %v3218_v7  ;;  %v2500_v7 = vld [vmem:[#allocation9 + $0x258] sm:$0xff]   ;;  %v2514_v63 = vld [vmem:[#allocation9 + $0x2f0] sm:$0xff]  }
 0x12a   :  { %v932_v52 = vpack.c.bf16 %v3266_v46, %v3273_v44  ;;  %v936_v45 = vpack.c.bf16 %v3270_v3, %v3276_v47  ;;  %v907_v23 = vmul.f32 %v892_v17, %v3214_v2  ;;  %v914_v59 = vmul.f32 %v3259_v10, %v3160_v34  ;;  %v2504_v34 = vld [vmem:[#allocation9 + $0x260] sm:$0xff]   ;;  %v2509_v10 = vld [vmem:[#allocation9 + $0x228] sm:$0xff]   ;;  %v2516_v5 = vld [vmem:[#allocation9 + $0x278] sm:$0xff]  }
 0x12b   :  { %1803 = vmatprep.mubr.bf16.mxu1 %v923_v6  ;;  %v931_v14 = vpack.c.bf16 %v888_v27, %v888_v27  ;;  %v913_v19 = vmul.f32 %v892_v17, %v3173_v51  ;;  %v925_v43 = vpack.c.bf16 %v879_v35, %v879_v35  ;;  %v2503_v51 = vld [vmem:[#allocation9 + $0x298] sm:$0xff]   ;;  %v2515_v17 = vld [vmem:[#allocation9 + $0x2b0] sm:$0xff]   ;;  %v902_v25 = vpop.permute.xlu0 %901 }
 0x12c   :  { %2247 = vmatpush3.bf16.msra.mxu0 %v2481_v20  ;;  %1804 = vmatmul.mubr.bf16.gmra.mrb[4].mxu1 %v921_v53  ;;  %v934_v2 = vpack.c.bf16 %v908_v33, %v907_v23  ;;  %v2518_v20 = vld [vmem:[#allocation9 + $0x2f8] sm:$0xff]   ;;  %v909_v42 = vmul.f32 %v902_v25, %v3247_v29  ;;  %v915_v53 = vmul.f32 %v902_v25, %v3282_v30 }
 0x12d   :  { %2248 = vmatprep.subr.bf16.mxu0 %v2484_v9  ;;  %1891 = vmatprep.mubr.bf16.mxu1 %v930_v55  ;;  %v938_v22 = vpack.c.bf16 %v914_v59, %v913_v19  ;;  %v2517_v9 = vld [vmem:[#allocation9 + $0x238] sm:$0xff]   ;;  %v912_v29 = vmul.f32 %v902_v25, %v3279_v40 }
 0x12e   :  { %v2519_v6 = vld [vmem:[#allocation9 + $0x2b8] sm:$0xff]   ;;  %v935_v55 = vpack.c.bf16 %v909_v42, %v909_v42 }
 0x12f   :  { %v937_v30 = vpack.c.bf16 %v912_v29, %v912_v29 }
 0x130   :  { %2249 = vmatpush3.bf16.msra.mxu0 %v2485_v57  ;;  %v939_v57 = vpack.c.bf16 %v915_v53, %v915_v53 }
 0x131   :  { %2290 = vmatprep.subr.bf16.mxu0 %v2488_v60  ;;  %v906_v60 = vmul.f32 %v902_v25, %v3230_v24  ;;  %v2079_v24 = vld [vmem:[%s3358_s6] ss:$0 sm:$0xff] }
 0x133   :  { %1844 = vmatmul.mubr.bf16.vlgmr.msra.gmra.mrb[8].mxu0 %v924_v37  ;;  %v2510_v37 = vld [vmem:[#allocation9 + $0x2e8] sm:$0xff]   ;;  %v933_v54 = vpack.c.bf16 %v906_v60, %v906_v60 }
 0x134   :  { %1851 = vmatprep.mubr.bf16.mxu0 %v927_v31  ;;  %2291 = vmatpush3.bf16.msra.mxu0 %v2489_v13 }
 0x135   :  { %1892 = vmatmul.mubr.bf16.vlgmr.msra.gmra.mrb[8].mxu1 %v928_v26  ;;  %2292 = vmatprep.subr.bf16.mxu0 %v2492_v4 }
 0x136   :  { %2319 = vmatpush3.bf16.msra.mxu1 %v2491_v8  ;;  %1899 = vmatprep.mubr.bf16.mxu1 %v931_v14 }
 0x137   :  { %2320 = vmatprep.subr.bf16.mxu1 %v2494_v12 }
 0x138   :  { %2293 = vmatpush3.bf16.msra.mxu0 %v2493_v16 }
 0x139   :  { %2294 = vmatprep.subr.bf16.mxu0 %v2496_v48 }
 0x13a   :  { %2321 = vmatpush3.bf16.msra.mxu1 %v2495_v28 }
 0x13b   :  { %1852 = vmatmul.mubr.bf16.gmra.mrb[12].mxu0 %v925_v43  ;;  %2322 = vmatprep.subr.bf16.mxu1 %v2498_v62 }
 0x13c   :  { %2295 = vmatpush3.bf16.msra.mxu0 %v2497_v21  ;;  %1939 = vmatprep.mubr.bf16.mxu0 %v934_v2 }
 0x13d   :  { %1900 = vmatmul.mubr.bf16.gmra.mrb[12].mxu1 %v929_v0  ;;  %2296 = vmatprep.subr.bf16.mxu0 %v2500_v7 }
 0x13e   :  { %2323 = vmatpush3.bf16.msra.mxu1 %v2499_v15  ;;  %1987 = vmatprep.mubr.bf16.mxu1 %v938_v22 }
 0x13f   :  { %2324 = vmatprep.subr.bf16.mxu1 %v2502_v32 }
 0x140   :  { %2297 = vmatpush3.bf16.msra.mxu0 %v2501_v11 }
 0x141   :  { %2298 = vmatprep.subr.bf16.mxu0 %v2504_v34 }
 0x142   :  { %2325 = vmatpush3.bf16.msra.mxu1 %v2503_v51 }
 0x143   :  { %2326 = vmatprep.subr.bf16.mxu1 %v2506_v36 }
 0x144   :  { %2299 = vmatpush3.bf16.msra.mxu0 %v2505_v39 }
 0x145   :  { %2300 = vmatprep.subr.bf16.mxu0 %v2508_v61 }
 0x146   :  { %2327 = vmatpush3.bf16.msra.mxu1 %v2507_v1 }
 0x147   :  { %2328 = vmatprep.subr.bf16.mxu1 %v2510_v37 }
 0x148   :  { %2301 = vmatpush3.bf16.msra.mxu0 %v2509_v10 }
 0x149   :  { %2302 = vmatprep.subr.bf16.mxu0 %v2512_v49 }
 0x14a   :  { %2329 = vmatpush3.bf16.msra.mxu1 %v2511_v38 }
 0x14b   :  { %2330 = vmatprep.subr.bf16.mxu1 %v2514_v63 }
 0x14c   :  { %2303 = vmatpush3.bf16.msra.mxu0 %v2513_v41 }
 0x14d   :  { %2304 = vmatprep.subr.bf16.mxu0 %v2516_v5 }
 0x14e   :  { %2331 = vmatpush3.bf16.msra.mxu1 %v2515_v17 }
 0x14f   :  { %2332 = vmatprep.subr.bf16.mxu1 %v2518_v20 }
 0x150   :  { %2305 = vmatpush3.bf16.msra.mxu0 %v2517_v9 }
 0x152   :  { %2333 = vmatpush3.bf16.msra.mxu1 %v2519_v6 }
 0x153   :  { %1940 = vmatmul.mubr.bf16.vlgmr.msra.gmra.mrb[16].mxu0 %v932_v52 }
 0x154   :  { %1947 = vmatprep.mubr.bf16.mxu0 %v935_v55 }
 0x155   :  { %1988 = vmatmul.mubr.bf16.vlgmr.msra.gmra.mrb[16].mxu1 %v936_v45 }
 0x156   :  { %1995 = vmatprep.mubr.bf16.mxu1 %v939_v57 }
 0x15b   :  { %1948 = vmatmul.mubr.bf16.gmra.mrb[20].mxu0 %v933_v54 }
 0x15d   :  { %1996 = vmatmul.mubr.bf16.gmra.mrb[20].mxu1 %v937_v30 }
 0x1d4   :  { %v2222_v58 = vpop.f32.mrb[0].mxu1 }
 0x1d5   :  { %v2223_v13 = vpop.f32.mrb[1].mxu1 }
 0x1d6   :  { %v2224_v27 = vadd.f32 %v2223_v13, %v2222_v58  ;;  %v2225_v46 = vpop.f32.mrb[2].mxu1 }
 0x1d7   :  { %v2226_v44 = vpop.f32.mrb[3].mxu1 }
 0x1d8   :  { %v2227_v52 = vadd.f32 %v2226_v44, %v2225_v46 }
 0x1e6   :  { %v2194_v56 = vpop.f32.mrb[0].mxu0 }
 0x1e7   :  { %v2195_v3 = vpop.f32.mrb[1].mxu0 }
 0x1e8   :  { %v2196_v47 = vadd.f32 %v2195_v3, %v2194_v56  ;;  %v2197_v45 = vpop.f32.mrb[2].mxu0 }
 0x1e9   :  { %v2198_v4 = vpop.f32.mrb[3].mxu0 }
 0x1ea   :  { %v1750_v40 = vadd.f32 %v2196_v47, %v2079_v24  ;;  %v2199_v31 = vadd.f32 %v2198_v4, %v2197_v45  ;;  %v2177_v45 = vld [vmem:[%s3360_s8] ss:$0 sm:$0xff] }
 0x1ec   :  { %v1753_v8 = vadd.f32 %v2199_v31, %v2079_v24  ;;  %v1798_v26 = vadd.f32 %v2224_v27, %v1750_v40 }
 0x1ee   :  { %v1801_v12 = vadd.f32 %v2227_v52, %v1753_v8  ;;  %v2176_v52 = vld [vmem:[%s3359_s7] ss:$0 sm:$0xff] }
 0x1fa   :  { %v2200_v14 = vpop.f32.mrb[4].mxu0 }
 0x1fb   :  { %v2201_v16 = vpop.f32.mrb[5].mxu0 }
 0x1fc   :  { %v2202_v35 = vadd.f32 %v2201_v16, %v2200_v14  ;;  %v2203_v48 = vpop.f32.mrb[6].mxu0 }
 0x1fd   :  { %v2204_v33 = vpop.f32.mrb[7].mxu0 }
 0x1fe   :  { %v1758_v62 = vadd.f32 %v2202_v35, %v2079_v24 }
 0x1ff   :  { %v2228_v23 = vpop.f32.mrb[4].mxu1 }
 0x200   :  { %v2229_v28 = vpop.f32.mrb[5].mxu1 }
 0x201   :  { %v2230_v18 = vadd.f32 %v2229_v28, %v2228_v23  ;;  %v2231_v59 = vpop.f32.mrb[6].mxu1 }
 0x202   :  { %v2232_v19 = vpop.f32.mrb[7].mxu1 }
 0x203   :  { %v1806_v21 = vadd.f32 %v2230_v18, %v1758_v62 }
 0x206   :  { %v2250_v43 = vpop.f32.mrb[8].mxu0 }
 0x207   :  { %v2251_v7 = vpop.f32.mrb[9].mxu0 }
 0x208   :  { %v2252_v2 = vadd.f32 %v2251_v7, %v2250_v43  ;;  %v2253_v15 = vpop.f32.mrb[10].mxu0  ;;  %v2278_v0 = vpop.f32.mrb[8].mxu1  ;;  %v2544_v7 = vld [vmem:[%s3352_s0] sm:$0xff] }
 0x209   :  { %v2254_v32 = vpop.f32.mrb[11].mxu0  ;;  %v2279_v22 = vpop.f32.mrb[9].mxu1 }
 0x20a   :  { %v1846_v11 = vadd.f32 %v2252_v2, %v1798_v26  ;;  %v2255_v34 = vadd.f32 %v2254_v32, %v2253_v15  ;;  %v2280_v51 = vadd.f32 %v2279_v22, %v2278_v0  ;;  %v2281_v36 = vpop.f32.mrb[10].mxu1  ;;  %v2545_v0 = vld [vmem:[%s3352_s0 + $0x8] sm:$0xff] }
 0x20b   :  { %v2282_v39 = vpop.f32.mrb[11].mxu1 }
 0x20c   :  { %v1849_v61 = vadd.f32 %v2255_v34, %v1801_v12  ;;  %v1894_v1 = vadd.f32 %v2280_v51, %v1846_v11  ;;  %v2283_v37 = vadd.f32 %v2282_v39, %v2281_v36 }
 0x20e   :  { %v1897_v10 = vadd.f32 %v2283_v37, %v1849_v61  ;;  %v2256_v49 = vpop.f32.mrb[12].mxu0 }
 0x20f   :  { %v2257_v38 = vpop.f32.mrb[13].mxu0 }
 0x210   :  { %v2258_v63 = vadd.f32 %v2257_v38, %v2256_v49  ;;  %v2259_v41 = vpop.f32.mrb[14].mxu0  ;;  %v2284_v5 = vpop.f32.mrb[12].mxu1 }
 0x211   :  { %v2260_v17 = vpop.f32.mrb[15].mxu0  ;;  %v2285_v25 = vpop.f32.mrb[13].mxu1 }
 0x212   :  { %v1854_v20 = vadd.f32 %v2258_v63, %v1806_v21  ;;  %v2286_v9 = vadd.f32 %v2285_v25, %v2284_v5  ;;  %v2287_v42 = vpop.f32.mrb[14].mxu1 }
 0x213   :  { %v2288_v6 = vpop.f32.mrb[15].mxu1 }
 0x214   :  { %v1902_v53 = vadd.f32 %v2286_v9, %v1854_v20 }
 0x226   :  { %v2306_v55 = vpop.f32.mrb[16].mxu0 }
 0x227   :  { %v2307_v57 = vpop.f32.mrb[17].mxu0 }
 0x228   :  { %v2308_v60 = vadd.f32 %v2307_v57, %v2306_v55  ;;  %v2334_v29 = vpop.f32.mrb[16].mxu1  ;;  %v2309_v54 = vpop.f32.mrb[18].mxu0 }
 0x229   :  { %v2335_v30 = vpop.f32.mrb[17].mxu1  ;;  %v2310_v58 = vpop.f32.mrb[19].mxu0 }
 0x22a   :  { %v1942_v13 = vadd.f32 %v2308_v60, %v1894_v1  ;;  %v2336_v27 = vadd.f32 %v2335_v30, %v2334_v29  ;;  %v2311_v46 = vadd.f32 %v2310_v58, %v2309_v54  ;;  %v2337_v44 = vpop.f32.mrb[18].mxu1 }
 0x22b   :  { %v2338_v56 = vpop.f32.mrb[19].mxu1 }
 0x22c   :  { %v1990_v24 = vadd.f32 %v2336_v27, %v1942_v13  ;;  %v1945_v3 = vadd.f32 %v2311_v46, %v1897_v10  ;;  %v2339_v47 = vadd.f32 %v2338_v56, %v2337_v44 }
 0x22e   :  { %v2010_v4 = vmul.f32 %v2176_v52, %v1990_v24  ;;  %v1993_v40 = vadd.f32 %v2339_v47, %v1945_v3  ;;  %v2312_v31 = vpop.f32.mrb[20].mxu0 }
 0x22f   :  { %v2313_v8 = vpop.f32.mrb[21].mxu0 }
 0x230   :  { %v2011_v26 = vmul.f32 %v2176_v52, %v1993_v40  ;;  %v2314_v12 = vadd.f32 %v2313_v8, %v2312_v31  ;;  %v2340_v14 = vpop.f32.mrb[20].mxu1  ;;  %v2315_v16 = vpop.f32.mrb[22].mxu0  ;;  %v2020_v35 = vadd.f32 %v2177_v45, %v2010_v4 }
 0x231   :  { %v2341_v48 = vpop.f32.mrb[21].mxu1  ;;  %v2316_v33 = vpop.f32.mrb[23].mxu0 }
 0x232   :  { %v1950_v23 = vadd.f32 %v2314_v12, %v1902_v53  ;;  %v2342_v28 = vadd.f32 %v2341_v48, %v2340_v14  ;;  %v2343_v62 = vpop.f32.mrb[22].mxu1  ;;  %v2021_v18 = vadd.f32 %v2177_v45, %v2011_v26  ;;  %v2023_v59 = vmax.f32 %v2020_v35, 0.0 }
 0x233   :  { %v2344_v19 = vpop.f32.mrb[23].mxu1 }
 0x234   :  { %v1998_v21 = vadd.f32 %v2342_v28, %v1950_v23  ;;  %v2024_v43 = vmax.f32 %v2021_v18, 0.0  ;;  %v2026_v2 = vadd.f32 %v2544_v7, %v2023_v59 }
 0x236   :  { %v2012_v15 = vmul.f32 %v2176_v52, %v1998_v21  ;;  %v2027_v32 = vadd.f32 %v2545_v0, %v2024_v43  ;;  %2029 = vst [vmem:[#allocation10] sm:$0xff] %v2026_v2 }
 0x238   :  { %v2022_v22 = vadd.f32 %v2177_v45, %v2012_v15  ;;  %2030 = vst [vmem:[#allocation10 + $0x8] sm:$0xff] %v2027_v32 }
 0x23a   :  { %v2025_v11 = vmax.f32 %v2022_v22, 0.0 }
 0x23c   :  { %v2028_v34 = vadd.f32 %v2025_v11, %v3099_v50 }
 0x23e   :  { %2031 = vst [vmem:[#allocation10 + $0x10] sm:$0xff] %v2028_v34 }
 0x23f   :  { %2635 = shalt.err (!%p2632_p5)
}
 0x240   :  { %s2636_s2 = scalar_lea.hbm %s3361_s9, 384 }
 0x241   :  { %p2637_p6 = scmp.ne.s32.totalorder %s3361_s9, %s2636_s2  ;;  %p2640_p7 = scmp.lt.u32.totalorder %s2636_s2, %s3361_s9 }
 0x243   :  { %p2642_p8 = pnand %p2640_p7, %p2637_p6 }
 0x245   :  { %2645 = shalt.err (!%p2642_p8)
}
 0x246   :  { %2043 = dma.vmem_to_hbm [thread:$0]  %s2038_s30, 384, %s3361_s9, [#allocation4], %s2658_s21, %s2658_s21, %s2659_s22  }
 0x247   :  { %2654 = dma.done.wait [#allocation4], 384  }
 0x248   :  { %2655 = vsyncadd [#allocation4], 4294966912 }
 0x249   :  { %2047 = vsyncpa [#allocation3], 1 }
 0x24a   :  { %2048 = vsyncpa [#allocation7], 1 }
 0x24b   :  { %2049 = vsyncpa [#allocation4], 1 }
 0x24c   :  { %2050 = vsyncpa [#allocation5], 1 }

</bundles_post_ra>
